<compile_context>
chip_gen: v7x
topology: tpu7x:2x2x1
jax: 0.10.0
libtpu: 0.0.40
codegen_flags: <defaults>
</compile_context>

<pallas_src>
import jax
import jax.numpy as jnp
from jax import lax
from jax.experimental import pallas as pl
from jax.experimental.pallas import tpu as pltpu

# dot_general dimension numbers (2-D operands).
NN = (((1,), (0,)), ((), ()))   # plain matmul:      (m,k) x (k,n) -> (m,n)
NT = (((1,), (1,)), ((), ()))   # rhs transposed:    (m,k) x (n,k) -> (m,n)


def _attention_kernel(xq_ref, xkv_ref, wq_ref, bq_ref, wkv_ref, bkv_ref,
                      o_ref, q_scr, m_scr, l_scr, acc_scr):
    ki = pl.program_id(2)
    c = wq_ref.shape[0]

    # First kv step for this (batch, q-tile): project Q once, reset softmax state.
    @pl.when(ki == 0)
    def _():
        q_cf = lax.dot_general(wq_ref[...], xq_ref[0], NN,
                               preferred_element_type=jnp.float32) + bq_ref[...]
        q_scr[...] = q_cf.T                      # (tq, c), once per q tile
        m_scr[...] = jnp.full_like(m_scr, -jnp.inf)
        l_scr[...] = jnp.zeros_like(l_scr)
        acc_scr[...] = jnp.zeros_like(acc_scr)

    # Fused K/V projection for the current kv tile: (2c, c) @ (c, tk) -> (2c, tk).
    kv = lax.dot_general(wkv_ref[...], xkv_ref[0], NN,
                         preferred_element_type=jnp.float32) + bkv_ref[...]
    k = kv[:c, :]                                # (c, tk)
    v = kv[c:, :]                                # (c, tk)

    # Scores: (tq, c) @ (c, tk) -> (tq, tk).  (No 1/sqrt(d): matches PyTorch.)
    s = lax.dot_general(q_scr[...], k, NN, preferred_element_type=jnp.float32)

    # Online softmax over the kv axis (lane reductions), all f32.
    m_prev = m_scr[...]                                              # (tq, 1)
    m_new = jnp.maximum(m_prev, jnp.max(s, axis=-1, keepdims=True))
    alpha = jnp.exp(m_prev - m_new)
    p = jnp.exp(s - m_new)                                           # (tq, tk)
    l_scr[...] = alpha * l_scr[...] + jnp.sum(p, axis=-1, keepdims=True)
    acc_scr[...] = alpha * acc_scr[...] + lax.dot_general(
        p, v, NT, preferred_element_type=jnp.float32)                # (tq, c)
    m_scr[...] = m_new

    # Last kv step: normalize, add residual, lane-dense (c, tq) store.
    @pl.when(ki == pl.num_programs(2) - 1)
    def _():
        # Exact reciprocal: runs once per q tile (off the per-kv-step hot path)
        # and keeps the 1e-4 match against the f32 reference.
        inv_l = pl.reciprocal(l_scr[...], approx=False)              # (tq, 1)
        attn_cl = acc_scr[...] * inv_l                               # (tq, c)
        o_ref[0] = (attn_cl.T + xq_ref[0]).astype(o_ref.dtype)       # (c, tq)


def _pick_tile(hw, candidates):
    for t in candidates:
        if hw % t == 0:
            return t
    return hw   # odd spatial sizes: single full-extent tile


def simple_attention(x_nchw, wq, bq, wk, bk, wv, bv):
    """x_nchw: (b, c, h, w) f32.  w*: (c, c) (Conv2d 1x1 weight squeezed), b*: (c,)."""
    b, c, h, w = x_nchw.shape
    hw = h * w

    # NCHW -> (b, c, hw): pure reshape of contiguous dims, no transpose.
    x = x_nchw.reshape(b, c, hw)

    tq = _pick_tile(hw, (128,))              # q-tile axis: extra "parallel" axis
    tk = _pick_tile(hw, (512, 256, 128))     # kv-tile axis: reduction ("arbitrary")
    nq = hw // tq
    nk = hw // tk

    # Fused K/V weight and column biases (broadcast along lanes in-kernel).
    wkv = jnp.concatenate([wk, wv], axis=0)                       # (2c, c)
    bq_col = bq.reshape(c, 1)
    bkv_col = jnp.concatenate([bk, bv], axis=0).reshape(2 * c, 1)

    grid_spec = pltpu.PrefetchScalarGridSpec(
        num_scalar_prefetch=0,
        grid=(b, nq, nk),
        in_specs=[
            pl.BlockSpec((1, c, tq), lambda bi, qi, ki: (bi, 0, qi)),  # x @ q rows
            pl.BlockSpec((1, c, tk), lambda bi, qi, ki: (bi, 0, ki)),  # x @ kv rows
            pl.BlockSpec((c, c),     lambda bi, qi, ki: (0, 0)),       # Wq
            pl.BlockSpec((c, 1),     lambda bi, qi, ki: (0, 0)),       # bq
            pl.BlockSpec((2 * c, c), lambda bi, qi, ki: (0, 0)),       # [Wk; Wv]
            pl.BlockSpec((2 * c, 1), lambda bi, qi, ki: (0, 0)),       # [bk; bv]
        ],
        out_specs=pl.BlockSpec((1, c, tq), lambda bi, qi, ki: (bi, 0, qi)),
        scratch_shapes=[
            pltpu.VMEM((tq, c), jnp.float32),   # projected q tile
            pltpu.VMEM((tq, 1), jnp.float32),   # running max  m
            pltpu.VMEM((tq, 1), jnp.float32),   # running sum  l
            pltpu.VMEM((tq, c), jnp.float32),   # output accumulator
        ],
    )

    out = pl.pallas_call(
        _attention_kernel,
        out_shape=jax.ShapeDtypeStruct((b, c, hw), x_nchw.dtype),
        grid_spec=grid_spec,
        compiler_params=pltpu.CompilerParams(
            dimension_semantics=("parallel", "parallel", "arbitrary")),
    )(x, x, wq, bq_col, wkv, bkv_col)

    return out.reshape(b, c, h, w)


def _reference(x_nchw, wq, bq, wk, bk, wv, bv):
    """Plain-JAX reference matching the PyTorch forward exactly."""
    b, c, h, w = x_nchw.shape
    x_flat = x_nchw.reshape(b, c, h * w)                 # (b, c, hw)
    proj = lambda W, bias: jnp.einsum('oc,bcn->bon', W, x_flat) + bias[None, :, None]
    q = proj(wq, bq)
    k = proj(wk, bk)
    v = proj(wv, bv)
    attn = jax.nn.softmax(jnp.einsum('bcn,bcm->bnm', q, k), axis=-1)  # (b, hw, hw)
    out = jnp.einsum('bnm,bcm->bcn', attn, v).reshape(b, c, h, w)
    return out + x_nchw


if __name__ == "__main__":
    key = jax.random.PRNGKey(0)
    b, c, h, w = 2, 4, 16, 16

    k_x, k_wq, k_bq, k_wk, k_bk, k_wv, k_bv = jax.random.split(key, 7)
    x = jax.random.normal(k_x, (b, c, h, w), dtype=jnp.float32)

    # Deterministic parameter init (Conv2d weight (c_out, c_in, 1, 1) -> (c, c)).
    scale = 1.0 / jnp.sqrt(jnp.float32(c))
    wq = jax.random.uniform(k_wq, (c, c), jnp.float32, -scale, scale)
    bq = jax.random.uniform(k_bq, (c,), jnp.float32, -scale, scale)
    wk = jax.random.uniform(k_wk, (c, c), jnp.float32, -scale, scale)
    bk = jax.random.uniform(k_bk, (c,), jnp.float32, -scale, scale)
    wv = jax.random.uniform(k_wv, (c, c), jnp.float32, -scale, scale)
    bv = jax.random.uniform(k_bv, (c,), jnp.float32, -scale, scale)

    out = simple_attention(x, wq, bq, wk, bk, wv, bv)
    out = jax.block_until_ready(out)

    ref = _reference(x, wq, bq, wk, bk, wv, bv)
    assert out.shape == (b, c, h, w)
    assert jnp.allclose(out, ref, atol=1e-4, rtol=1e-4), "mismatch vs reference"

    print("KERNEL_OK")
</pallas_src>

<mosaic_0001>
module attributes {stable_mosaic.version = 11 : i64} {
  func.func @_attention_kernel(%arg0: i32, %arg1: i32, %arg2: i32, %arg3: memref<1x4x128xf32, #tpu.memory_space<vmem>>, %arg4: memref<1x4x256xf32, #tpu.memory_space<vmem>>, %arg5: memref<4x4xf32, #tpu.memory_space<vmem>>, %arg6: memref<4x1xf32, #tpu.memory_space<vmem>>, %arg7: memref<8x4xf32, #tpu.memory_space<vmem>>, %arg8: memref<8x1xf32, #tpu.memory_space<vmem>>, %arg9: memref<1x4x128xf32, #tpu.memory_space<vmem>>, %arg10: memref<128x4xf32, #tpu.memory_space<vmem>>, %arg11: memref<128x1xf32, #tpu.memory_space<vmem>>, %arg12: memref<128x1xf32, #tpu.memory_space<vmem>>, %arg13: memref<128x4xf32, #tpu.memory_space<vmem>>) attributes {dimension_semantics = [#tpu.dimension_semantics<parallel>, #tpu.dimension_semantics<parallel>, #tpu.dimension_semantics<arbitrary>], iteration_bounds = array<i64: 2, 2, 1>, scalar_prefetch = 0 : i64, scratch_operands = 4 : i64, tpu.core_type = #tpu.core_type<tc>, window_params = [{transform_indices = @transform_0, window_bounds = array<i64: 1, 4, 128>}, {transform_indices = @transform_1, window_bounds = array<i64: 1, 4, 256>}, {pipeline_mode = #tpu.pipeline_mode<synchronous>, transform_indices = @transform_2, window_bounds = array<i64: 4, 4>}, {pipeline_mode = #tpu.pipeline_mode<synchronous>, transform_indices = @transform_3, window_bounds = array<i64: 4, 1>}, {pipeline_mode = #tpu.pipeline_mode<synchronous>, transform_indices = @transform_4, window_bounds = array<i64: 8, 4>}, {pipeline_mode = #tpu.pipeline_mode<synchronous>, transform_indices = @transform_5, window_bounds = array<i64: 8, 1>}, {transform_indices = @transform_6, window_bounds = array<i64: 1, 4, 128>}]} {
    %c0_i32 = arith.constant 0 : i32
    %0 = arith.cmpi eq, %arg2, %c0_i32 : i32
    %1 = arith.extui %0 : i1 to i32
    %c0_i32_0 = arith.constant 0 : i32
    %2 = arith.cmpi ne, %1, %c0_i32_0 : i32
    scf.if %2 {
      %c0_27 = arith.constant 0 : index
      %c0_28 = arith.constant 0 : index
      %39 = vector.load %arg5[%c0_27, %c0_28] : memref<4x4xf32, #tpu.memory_space<vmem>>, vector<4x4xf32>
      %c0_29 = arith.constant 0 : index
      %c0_30 = arith.constant 0 : index
      %c0_31 = arith.constant 0 : index
      %40 = vector.load %arg3[%c0_29, %c0_30, %c0_31] : memref<1x4x128xf32, #tpu.memory_space<vmem>>, vector<1x4x128xf32>
      %41 = vector.shape_cast %40 : vector<1x4x128xf32> to vector<4x128xf32>
      %cst_32 = arith.constant dense<0.000000e+00> : vector<4x128xf32>
      %42 = tpu.matmul %39, %41, %cst_32 {dimension_numbers = #tpu.dot_dimension_numbers<[1], [0], [0], [1], [0, 0, 1, 1], [], []>} : vector<4x4xf32>, vector<4x128xf32>, vector<4x128xf32> -> vector<4x128xf32>
      %c0_33 = arith.constant 0 : index
      %c0_34 = arith.constant 0 : index
      %43 = vector.load %arg6[%c0_33, %c0_34] : memref<4x1xf32, #tpu.memory_space<vmem>>, vector<4x1xf32>
      %44 = vector.broadcast %43 : vector<4x1xf32> to vector<4x128xf32>
      %45 = arith.addf %42, %44 : vector<4x128xf32>
      %46 = tpu.transpose %45, [1, 0] : vector<4x128xf32> -> vector<128x4xf32>
      %c0_35 = arith.constant 0 : index
      %c0_36 = arith.constant 0 : index
      %47 = vector.load %arg10[%c0_35, %c0_36] : memref<128x4xf32, #tpu.memory_space<vmem>>, vector<128x4xf32>
      tpu.vector_store %arg10[%c0_35, %c0_36], %46 {strides = array<i32>} : memref<128x4xf32, #tpu.memory_space<vmem>>, vector<128x4xf32>,
      %cst_37 = arith.constant 0xFF800000 : f32
      %48 = vector.broadcast %cst_37 : f32 to vector<128x1xf32>
      %c0_38 = arith.constant 0 : index
      %c0_39 = arith.constant 0 : index
      %49 = vector.load %arg11[%c0_38, %c0_39] : memref<128x1xf32, #tpu.memory_space<vmem>>, vector<128x1xf32>
      tpu.vector_store %arg11[%c0_38, %c0_39], %48 {strides = array<i32>} : memref<128x1xf32, #tpu.memory_space<vmem>>, vector<128x1xf32>,
      %cst_40 = arith.constant 0.000000e+00 : f32
      %50 = vector.broadcast %cst_40 : f32 to vector<128x1xf32>
      %c0_41 = arith.constant 0 : index
      %c0_42 = arith.constant 0 : index
      %51 = vector.load %arg12[%c0_41, %c0_42] : memref<128x1xf32, #tpu.memory_space<vmem>>, vector<128x1xf32>
      tpu.vector_store %arg12[%c0_41, %c0_42], %50 {strides = array<i32>} : memref<128x1xf32, #tpu.memory_space<vmem>>, vector<128x1xf32>,
      %cst_43 = arith.constant 0.000000e+00 : f32
      %52 = vector.broadcast %cst_43 : f32 to vector<128x4xf32>
      %c0_44 = arith.constant 0 : index
      %c0_45 = arith.constant 0 : index
      %53 = vector.load %arg13[%c0_44, %c0_45] : memref<128x4xf32, #tpu.memory_space<vmem>>, vector<128x4xf32>
      tpu.vector_store %arg13[%c0_44, %c0_45], %52 {strides = array<i32>} : memref<128x4xf32, #tpu.memory_space<vmem>>, vector<128x4xf32>,
    } else {
    }
    %c0 = arith.constant 0 : index
    %c0_1 = arith.constant 0 : index
    %3 = vector.load %arg7[%c0, %c0_1] : memref<8x4xf32, #tpu.memory_space<vmem>>, vector<8x4xf32>
    %c0_2 = arith.constant 0 : index
    %c0_3 = arith.constant 0 : index
    %c0_4 = arith.constant 0 : index
    %4 = vector.load %arg4[%c0_2, %c0_3, %c0_4] : memref<1x4x256xf32, #tpu.memory_space<vmem>>, vector<1x4x256xf32>
    %5 = vector.shape_cast %4 : vector<1x4x256xf32> to vector<4x256xf32>
    %cst = arith.constant dense<0.000000e+00> : vector<8x256xf32>
    %6 = tpu.matmul %3, %5, %cst {dimension_numbers = #tpu.dot_dimension_numbers<[1], [0], [0], [1], [0, 0, 1, 1], [], []>} : vector<8x4xf32>, vector<4x256xf32>, vector<8x256xf32> -> vector<8x256xf32>
    %c0_5 = arith.constant 0 : index
    %c0_6 = arith.constant 0 : index
    %7 = vector.load %arg8[%c0_5, %c0_6] : memref<8x1xf32, #tpu.memory_space<vmem>>, vector<8x1xf32>
    %8 = vector.broadcast %7 : vector<8x1xf32> to vector<8x256xf32>
    %9 = arith.addf %6, %8 : vector<8x256xf32>
    %10 = vector.extract_strided_slice %9 {offsets = [0, 0], sizes = [4, 256], strides = [1, 1]} : vector<8x256xf32> to vector<4x256xf32>
    %11 = vector.extract_strided_slice %9 {offsets = [4, 0], sizes = [4, 256], strides = [1, 1]} : vector<8x256xf32> to vector<4x256xf32>
    %c0_7 = arith.constant 0 : index
    %c0_8 = arith.constant 0 : index
    %12 = vector.load %arg10[%c0_7, %c0_8] : memref<128x4xf32, #tpu.memory_space<vmem>>, vector<128x4xf32>
    %cst_9 = arith.constant dense<0.000000e+00> : vector<128x256xf32>
    %13 = tpu.matmul %12, %10, %cst_9 {dimension_numbers = #tpu.dot_dimension_numbers<[1], [0], [0], [1], [0, 0, 1, 1], [], []>} : vector<128x4xf32>, vector<4x256xf32>, vector<128x256xf32> -> vector<128x256xf32>
    %c0_10 = arith.constant 0 : index
    %c0_11 = arith.constant 0 : index
    %14 = vector.load %arg11[%c0_10, %c0_11] : memref<128x1xf32, #tpu.memory_space<vmem>>, vector<128x1xf32>
    %cst_12 = arith.constant dense<0xFF800000> : vector<128xf32>
    %15 = vector.multi_reduction <maximumf>, %13, %cst_12 [1] : vector<128x256xf32> to vector<128xf32>
    %16 = vector.shape_cast %15 : vector<128xf32> to vector<128x1xf32>
    %17 = arith.maximumf %14, %16 : vector<128x1xf32>
    %18 = arith.subf %14, %17 : vector<128x1xf32>
    %19 = math.exp %18 : vector<128x1xf32>
    %20 = vector.broadcast %17 : vector<128x1xf32> to vector<128x256xf32>
    %21 = arith.subf %13, %20 : vector<128x256xf32>
    %22 = math.exp %21 : vector<128x256xf32>
    %c0_13 = arith.constant 0 : index
    %c0_14 = arith.constant 0 : index
    %23 = vector.load %arg12[%c0_13, %c0_14] : memref<128x1xf32, #tpu.memory_space<vmem>>, vector<128x1xf32>
    %24 = arith.mulf %19, %23 : vector<128x1xf32>
    %cst_15 = arith.constant dense<0.000000e+00> : vector<128xf32>
    %25 = vector.multi_reduction <add>, %22, %cst_15 [1] : vector<128x256xf32> to vector<128xf32>
    %26 = vector.shape_cast %25 : vector<128xf32> to vector<128x1xf32>
    %27 = arith.addf %24, %26 : vector<128x1xf32>
    %c0_16 = arith.constant 0 : index
    %c0_17 = arith.constant 0 : index
    %28 = vector.load %arg12[%c0_16, %c0_17] : memref<128x1xf32, #tpu.memory_space<vmem>>, vector<128x1xf32>
    tpu.vector_store %arg12[%c0_16, %c0_17], %27 {strides = array<i32>} : memref<128x1xf32, #tpu.memory_space<vmem>>, vector<128x1xf32>,
    %c0_18 = arith.constant 0 : index
    %c0_19 = arith.constant 0 : index
    %29 = vector.load %arg13[%c0_18, %c0_19] : memref<128x4xf32, #tpu.memory_space<vmem>>, vector<128x4xf32>
    %30 = vector.broadcast %19 : vector<128x1xf32> to vector<128x4xf32>
    %31 = arith.mulf %30, %29 : vector<128x4xf32>
    %cst_20 = arith.constant dense<0.000000e+00> : vector<128x4xf32>
    %32 = tpu.matmul %22, %11, %cst_20 {dimension_numbers = #tpu.dot_dimension_numbers<[1], [1], [0], [0], [0, 0, 1, 0], [], []>} : vector<128x256xf32>, vector<4x256xf32>, vector<128x4xf32> -> vector<128x4xf32>
    %33 = arith.addf %31, %32 : vector<128x4xf32>
    %c0_21 = arith.constant 0 : index
    %c0_22 = arith.constant 0 : index
    %34 = vector.load %arg13[%c0_21, %c0_22] : memref<128x4xf32, #tpu.memory_space<vmem>>, vector<128x4xf32>
    tpu.vector_store %arg13[%c0_21, %c0_22], %33 {strides = array<i32>} : memref<128x4xf32, #tpu.memory_space<vmem>>, vector<128x4xf32>,
    %c0_23 = arith.constant 0 : index
    %c0_24 = arith.constant 0 : index
    %35 = vector.load %arg11[%c0_23, %c0_24] : memref<128x1xf32, #tpu.memory_space<vmem>>, vector<128x1xf32>
    tpu.vector_store %arg11[%c0_23, %c0_24], %17 {strides = array<i32>} : memref<128x1xf32, #tpu.memory_space<vmem>>, vector<128x1xf32>,
    %c0_i32_25 = arith.constant 0 : i32
    %36 = arith.cmpi eq, %arg2, %c0_i32_25 : i32
    %37 = arith.extui %36 : i1 to i32
    %c0_i32_26 = arith.constant 0 : i32
    %38 = arith.cmpi ne, %37, %c0_i32_26 : i32
    scf.if %38 {
      %c0_27 = arith.constant 0 : index
      %c0_28 = arith.constant 0 : index
      %39 = vector.load %arg12[%c0_27, %c0_28] : memref<128x1xf32, #tpu.memory_space<vmem>>, vector<128x1xf32>
      %40 = tpu.reciprocal %39 : vector<128x1xf32> -> vector<128x1xf32>
      %c0_29 = arith.constant 0 : index
      %c0_30 = arith.constant 0 : index
      %41 = vector.load %arg13[%c0_29, %c0_30] : memref<128x4xf32, #tpu.memory_space<vmem>>, vector<128x4xf32>
      %42 = vector.broadcast %40 : vector<128x1xf32> to vector<128x4xf32>
      %43 = arith.mulf %41, %42 : vector<128x4xf32>
      %44 = tpu.transpose %43, [1, 0] : vector<128x4xf32> -> vector<4x128xf32>
      %c0_31 = arith.constant 0 : index
      %c0_32 = arith.constant 0 : index
      %c0_33 = arith.constant 0 : index
      %45 = vector.load %arg3[%c0_31, %c0_32, %c0_33] : memref<1x4x128xf32, #tpu.memory_space<vmem>>, vector<1x4x128xf32>
      %46 = vector.shape_cast %45 : vector<1x4x128xf32> to vector<4x128xf32>
      %47 = arith.addf %44, %46 : vector<4x128xf32>
      %c0_34 = arith.constant 0 : index
      %c0_35 = arith.constant 0 : index
      %c0_36 = arith.constant 0 : index
      %48 = vector.load %arg9[%c0_34, %c0_35, %c0_36] : memref<1x4x128xf32, #tpu.memory_space<vmem>>, vector<1x4x128xf32>
      %49 = vector.shape_cast %48 : vector<1x4x128xf32> to vector<4x128xf32>
      %50 = vector.shape_cast %47 : vector<4x128xf32> to vector<1x4x128xf32>
      tpu.vector_store %arg9[%c0_34, %c0_35, %c0_36], %50 {strides = array<i32>} : memref<1x4x128xf32, #tpu.memory_space<vmem>>, vector<1x4x128xf32>,
    } else {
    }
    return
  }
  func.func @transform_0(%arg0: i32, %arg1: i32, %arg2: i32) -> (i32, i32, i32) {
    %c0_i32 = arith.constant 0 : i32
    %c0_i32_0 = arith.constant 0 : i32
    return %arg0, %c0_i32, %arg1 : i32, i32, i32
  }
  func.func @transform_1(%arg0: i32, %arg1: i32, %arg2: i32) -> (i32, i32, i32) {
    %c0_i32 = arith.constant 0 : i32
    %c0_i32_0 = arith.constant 0 : i32
    return %arg0, %c0_i32, %arg2 : i32, i32, i32
  }
  func.func @transform_2(%arg0: i32, %arg1: i32, %arg2: i32) -> (i32, i32) {
    %c0_i32 = arith.constant 0 : i32
    %c0_i32_0 = arith.constant 0 : i32
    %c0_i32_1 = arith.constant 0 : i32
    return %c0_i32, %c0_i32_0 : i32, i32
  }
  func.func @transform_3(%arg0: i32, %arg1: i32, %arg2: i32) -> (i32, i32) {
    %c0_i32 = arith.constant 0 : i32
    %c0_i32_0 = arith.constant 0 : i32
    %c0_i32_1 = arith.constant 0 : i32
    return %c0_i32, %c0_i32_0 : i32, i32
  }
  func.func @transform_4(%arg0: i32, %arg1: i32, %arg2: i32) -> (i32, i32) {
    %c0_i32 = arith.constant 0 : i32
    %c0_i32_0 = arith.constant 0 : i32
    %c0_i32_1 = arith.constant 0 : i32
    return %c0_i32, %c0_i32_0 : i32, i32
  }
  func.func @transform_5(%arg0: i32, %arg1: i32, %arg2: i32) -> (i32, i32) {
    %c0_i32 = arith.constant 0 : i32
    %c0_i32_0 = arith.constant 0 : i32
    %c0_i32_1 = arith.constant 0 : i32
    return %c0_i32, %c0_i32_0 : i32, i32
  }
  func.func @transform_6(%arg0: i32, %arg1: i32, %arg2: i32) -> (i32, i32, i32) {
    %c0_i32 = arith.constant 0 : i32
    %c0_i32_0 = arith.constant 0 : i32
    return %arg0, %c0_i32, %arg1 : i32, i32, i32
  }
}

</mosaic_0001>

<bundles_post_ra>
// kernel: tpu_custom_call.1
= control target key start
LH: loop header
LB: loop body
LE: loop exit
PB: predicated region body
PF: predicated region fallthrough
CT: control target
= control target key end

     0   :  { %s3160_s0 = inlined_call_operand.vmem [shape: f32[2,4,256], index: 0, kind: input, shape index: {}]   ;;  %s3161_s1 = inlined_call_operand.hbm [shape: f32[2,4,256], index: 1, kind: input, shape index: {}]   ;;  %s3162_s2 = inlined_call_operand.vmem [shape: f32[4,4], index: 2, kind: input, shape index: {}]   ;;  %s3163_s3 = inlined_call_operand.vmem [shape: f32[4,1], index: 3, kind: input, shape index: {}]   ;;  %s3164_s4 = inlined_call_operand.vmem [shape: f32[8,4], index: 4, kind: input, shape index: {}]   ;;  %s3165_s5 = inlined_call_operand.vmem [shape: f32[8,1], index: 5, kind: input, shape index: {}]   ;;  %s3166_s6 = inlined_call_operand.hbm [shape: f32[2,4,256], index: 6, kind: output, shape index: {}]  }
   0x1   :  { %3184 = sst [smem:[#allocation29_spill]] %s3161_s1 }
   0x2   :  { %11 = vsyncpa [#allocation7], 0 }
   0x3   :  { %13 = vsyncpa [#allocation7 + $0x1], 0 }
   0x4   :  { %14 = vsyncpa [#allocation8], 0 }
   0x5   :  { %16 = vsyncpa [#allocation8 + $0x1], 0  ;;  %s2344_s21 = smov 0   ;;  %s2346_s22 = smov 0  }
   0x6   :  { %s2348_s23 = smov 0   ;;  %s2350_s24 = smov 0  }
   0x7   :  { %s2352_s25 = smov 0   ;;  %s2354_s26 = smov 0  }
   0x8   :  { %s2356_s27 = smov 0   ;;  %s2358_s28 = smov 0  }
   0x9   :  { %s2360_s29 = smov 0   ;;  %s2362_s30 = smov 0  }
   0xa   :  { %s2364_s7 = smov 0  }
   0xb LB: > { %3185 = sst [smem:[#allocation12_spill]] %s2293_s29  ;;  %s1864_s8 = sadd.s32 4294967295, %s2301_s7   ;;  %s2301_s7 = sphi %s2364_s7, %s22_s7   ;;  %s2297_s30 = sphi %s2362_s30, %s3243_s30   ;;  %s2293_s29 = sphi %s2360_s29, %s3242_s29   ;;  %s2289_s28 = sphi %s2358_s28, %s3241_s28   ;;  %s2285_s27 = sphi %s2356_s27, %s3240_s27   ;;  %s2281_s26 = sphi %s2354_s26, %s3249_s26   ;;  %s2277_s25 = sphi %s2352_s25, %s3248_s25   ;;  %s2273_s24 = sphi %s2350_s24, %s3247_s24   ;;  %s2269_s23 = sphi %s2348_s23, %s3246_s23   ;;  %s2265_s22 = sphi %s2346_s22, %s3245_s22   ;;  %s2261_s21 = sphi %s2344_s21, %s3244_s21  }
   0xc   : > { %3186 = sst [smem:[#allocation13_spill]] %s2297_s30  ;;  %s1865_s9 = sadd.s32 4294967294, %s2301_s7  }
   0xd   : > { %s37_s10 = sadd.s32 1, %s2293_s29  ;;  %s41_s11 = sadd.s32 1, %s2297_s30 }
   0xe   : > { %p39_p0 = scmp.ge.s32.totalorder %s37_s10, 2  ;;  %s78_s12 = sadd.s32 1, %s2281_s26 }
   0xf   : > { %p85_p1 = scmp.ne.s32.totalorder %s2281_s26, %s2277_s25  ;;  %p86_p2 = scmp.eq.s32.totalorder %s2301_s7, 0 }
  0x10   : > { %s3251_s10 = smov (%p39_p0, %s37_s10), 0  ;;  %s3253_s11 = smov (!%p39_p0, %s41_s11), %s2297_s30 }
  0x11   : > { %3187 = sst [smem:[#allocation14_spill]] %s3251_s10  ;;  %p2408_p3 = por %p86_p2, %p85_p1 }
  0x12   : > { %p91_p4 = scmp.ne.s32.totalorder %s2277_s25, %s2273_s24  ;;  %p43_p5 = scmp.ge.s32.totalorder %s3253_s11, 2 }
  0x13   : > { %p92_p6 = scmp.eq.s32.totalorder %s1864_s8, 0  ;;  %s186_s14 = ssub.s32 %s2293_s29, %s3251_s10 }
  0x14   : > { %s190_s15 = sadd.s32 1, %s2269_s23  ;;  %s3255_s11 = smov (%p43_p5, %s3253_s11), 0 }
  0x15   : > { %3189 = sst [smem:[#allocation15_spill]] %s3255_s11  ;;  %p2418_p7 = por %p92_p6, %p91_p4 }
  0x16   : > { %p200_p8 = scmp.ne.s32.totalorder %s2269_s23, %s2265_s22  ;;  %s73_s17 = ssub.s32 %s2297_s30, %s3255_s11 }
  0x17   : > { %p201_p9 = scmp.eq.s32.totalorder %s1864_s8, 3  ;;  %p76_p10 = scmp.eq.s32.totalorder %s73_s17, 0 }
  0x18   : > { %s187_s18 = sor.u32 %s186_s14, %s73_s17  ;;  %p206_p13 = scmp.ne.s32.totalorder %s2265_s22, %s2261_s21 }
  0x19   : > { %p188_p11 = scmp.eq.s32.totalorder %s187_s18, 0  ;;  %p2426_p12 = por %p201_p9, %p200_p8 }
  0x1a   : > { %s2431_s20 = scalar_select %p76_p10, %s2281_s26, %s78_s12  }
  0x1b   : > { %s3191_s19 = scalar_select %p2426_p12, 1, 0 }
  0x1c   : > { %3192 = sst [smem:[#allocation16_spill]] %s2431_s20  ;;  %p207_p0 = scmp.eq.s32.totalorder %s1865_s9, 3 }
  0x1d   : > { %s2434_s24 = scalar_select %p188_p11, %s2269_s23, %s190_s15  }
  0x1e   : > { %p1924_p1 = scmp.lt.s32.totalorder %s2301_s7, 4  ;;  %p2439_p2 = por %p207_p0, %p206_p13 }
  0x1f   : > { %s250_s8 = sand.u32 1, %s2281_s26   ;;  %s1904_s17 = sshll.u32 %s2297_s30, 7 }
  0x20   : > { %s3193_s11 = scalar_select %p2439_p2, 1, 0 }
  0x21   : > { %s1868_s14 = sshll.u32 %s250_s8, 3  ;;  %s3194_s1 = sld [smem:[#allocation29_spill]] }
  0x22   : > { %s254_s12 = scalar_lea.vmem [#allocation6], %s1868_s14  ;;  %p2454_p4 = pnand %p1924_p1, %p2408_p3 }
  0x23   : > { %s264_s15 = sshll.u32 %s254_s12, 4  ;;  %s251_s10 = scalar_lea.sflag [#allocation7], %s250_s8  ;;  %s2450_s15 = int_to_ptr.vmem [resolvable:$true] %s264_s15 }
  0x24   : > { %p2151_p9 = pneg %p2454_p4 }
  0x27   : > { %s2448_s29 = scalar_lea.hbm %s3194_s1, %s1904_s17  ;;  %s2154_s13 = scalar_lea.hbm %s3194_s1, 256 }
  0x28   : > { %s2149_s17 = scalar_lea.hbm %s2448_s29, 128  ;;  %p2155_p3 = scmp.lt.u32.totalorder %s2448_s29, %s3194_s1 }
  0x29   : > { %p2150_p8 = scmp.ne.s32.totalorder %s2448_s29, %s2149_s17  ;;  %p2156_p13 = scmp.lt.u32.totalorder %s2154_s13, %s2149_s17 }
  0x2a   : > { %p2158_p1 = scmp.lt.u32.totalorder %s2149_s17, %s2448_s29 }
  0x2b   : > { %p2152_p10 = pnand %p2151_p9, %p2150_p8  ;;  %p2157_p0 = por %p2156_p13, %p2155_p3 }
  0x2d   : > { %p2153_p11 = pneg %p2152_p10  ;;  %p2159_p5 = por %p2158_p1, %p2157_p0 }
  0x2f   : > { %p2160_p6 = pnand %p2159_p5, %p2153_p11 }
  0x31   : > { %2163 = shalt.err (!%p2160_p6)
}
  0x32   : > { %s2164_s8 = scalar_lea.vmem %s2450_s15, 128  ;;  %s2303_s14 = smov [#allocation6]  }
  0x33   : > { %p2165_p8 = scmp.ne.s32.totalorder %s2450_s15, %s2164_s8  ;;  %s2169_s18 = sshll.u32 %s2303_s14, 4  ;;  %s2170_s18 = int_to_ptr.vmem [resolvable:$false] %s2169_s18 }
  0x34   : > { %s2171_s30 = scalar_lea.vmem %s2170_s18, 256  ;;  %p2172_p12 = scmp.lt.s32.totalorder %s2450_s15, %s2170_s18 }
  0x35   : > { %p2167_p10 = pnand %p2165_p8, %p2151_p9  ;;  %p2173_p3 = scmp.lt.s32.totalorder %s2171_s30, %s2164_s8 }
  0x37   : > { %p2168_p2 = pneg %p2167_p10  ;;  %p2174_p13 = por %p2173_p3, %p2172_p12 }
  0x39   : > { %p2175_p0 = pnand %p2174_p13, %p2168_p2 }
  0x3b   : > { %2178 = shalt.err (!%p2175_p0)
}
  0x3c   : > { %1919 = dma.hbm_to_vmem [thread:$0]  (!%p2454_p4), %s2448_s29, 128, %s2450_s15, %s251_s10  }
  0x3d   : > { %p3196_p5 = scmp.lt.s32.totalorder %s2301_s7, 5  ;;  %p3197_p6 = scmp.ge.s32.totalorder %s2301_s7, 1 }
  0x3f   : > { %p270_p9 = pnand %p3197_p6, %p3196_p5 }
  0x41   : > { %273 = sbr.rel (%p270_p9) target bundleno = 1417 (0x589), region = 44 }
  0x48   : > { %s275_s17 = sand.u32 1, %s2277_s25  }
  0x49   : > { %s2490_s13 = sshll.u32 %s275_s17, 3  ;;  %s276_s12 = scalar_lea.sflag [#allocation7], %s275_s17 }
  0x4a   : > { %s279_s8 = scalar_lea.vmem [#allocation6], %s2490_s13 }
  0x4b   : > { %2252 = dma.done.wait (%p2418_p7), %s276_s12, 128  }
  0x4c   : > { %2254 = vsyncadd (%p2418_p7), %s276_s12, 4294967168  ;;  %p316_p12 = scmp.lt.s32.totalorder %s2289_s28, 1  ;;  %p318_p2 = scmp.lt.s32.totalorder %s2285_s27, 1  ;;  %v2304_v0 = vmov 0.0   ;;  %vm2305_vm0 = vmmov 0   ;;  %vm337_vm1 = vcmask 31744  }
  0x4d   : > { %1907 = vmatprep.subr.mxu0 %v2304_v0  ;;  %1909 = vmatprep.mubr.msk.f32.mxu0 %vm2305_vm0, %v2304_v0  ;;  %496 = vst.msk [vmem:[#allocation5] sm:$0xff] %vm337_vm1, %v2304_v0  ;;  %497 = vst.msk [vmem:[#allocation5 + $0x8] sm:$0xff] %vm337_vm1, %v2304_v0  ;;  %v2306_v1 = vmov 0   ;;  %vm341_vm2 = vcmask 1043456   ;;  %v329_v2 = vld [vmem:[%s3162_s2] sm:$0xf] }
  0x4e   : > { %s317_s29 = scalar_select %p316_p12, %s2289_s28, 1  ;;  %498 = vst.msk [vmem:[#allocation5 + $0x10] sm:$0xff] %vm337_vm1, %v2304_v0  ;;  %499 = vst.msk [vmem:[#allocation5 + $0x18] sm:$0xff] %vm337_vm1, %v2304_v0  ;;  %595 = vmatprep.mubr.f32.mxu1 %v2304_v0  ;;  %2018 = vset.pattern.permute.xlu0 %v2306_v1  ;;  %v513_v3 = vld [vmem:[%s279_s8] sm:$0xff]  ;;  %vm463_vm3 = vcmask 7168   ;;  %v2307_v52 = vmov -inf  }
  0x4f   : > { %500 = vst.msk [vmem:[#allocation5 + $0x20] sm:$0xff] %vm337_vm1, %v2304_v0  ;;  %501 = vst.msk [vmem:[#allocation5 + $0x28] sm:$0xff] %vm337_vm1, %v2304_v0  ;;  %s319_s16 = scalar_select %p318_p2, %s2285_s27, 1  ;;  %v521_v5 = vcombine.high %v513_v3, %v513_v3  ;;  %v331_v6 = vld [vmem:[%s3163_s3] sm:$0xf] }
  0x50   : > { %502 = vst.msk [vmem:[#allocation5 + $0x30] sm:$0xff] %vm337_vm1, %v2304_v0  ;;  %503 = vst.msk [vmem:[#allocation5 + $0x38] sm:$0xff] %vm337_vm1, %v2304_v0  ;;  %s1874_s15 = sshll.u32 %s317_s29, 1  ;;  %v512_v7 = vld [vmem:[%s3164_s4] sm:$0xff]  ;;  %334 = vperm.xlu0 %2018, %v331_v6   ;;  %s313_s1 = sand.u32 1, %s2265_s22  }
  0x51   : > { %504 = vst.msk [vmem:[#allocation5 + $0x40] sm:$0xff] %vm337_vm1, %v2304_v0  ;;  %505 = vst.msk [vmem:[#allocation5 + $0x48] sm:$0xff] %vm337_vm1, %v2304_v0  ;;  %s321_s9 = sadd.s32 %s1874_s15, %s319_s16  ;;  %1878 = vmatprep.subr.msk.mxu1 %vm341_vm2, %v521_v5  ;;  %v514_v8 = vld [vmem:[%s3165_s5] sm:$0xff]  ;;  %s1873_s20 = sshll.u32 %s313_s1, 2 }
  0x52   : > { %506 = vst.msk [vmem:[#allocation5 + $0x50] sm:$0xff] %vm337_vm1, %v2304_v0  ;;  %507 = vst.msk [vmem:[#allocation5 + $0x58] sm:$0xff] %vm337_vm1, %v2304_v0  ;;  %s1875_s10 = sshll.u32 %s321_s9, 2  ;;  %1879 = vmatpush1.msk.msra.mxu1 %vm341_vm2, %v513_v3  ;;  %s1900_s8 = sshll.u32 %s2289_s28, 1 }
  0x53   : > { %508 = vst.msk [vmem:[#allocation5 + $0x60] sm:$0xff] %vm337_vm1, %v2304_v0  ;;  %509 = vst.msk [vmem:[#allocation5 + $0x68] sm:$0xff] %vm337_vm1, %v2304_v0  ;;  %s2541_s30 = scalar_lea.vmem %s3160_s0, %s1875_s10  ;;  %1880 = vmatmul.mubr.msk.f32.vlgmr.msra.gmra.mrb[0].mxu1 %vm337_vm1, %v512_v7  ;;  %s1753_s9 = sadd.s32 %s2285_s27, %s1900_s8 }
  0x54   : > { %510 = vst.msk [vmem:[#allocation5 + $0x70] sm:$0xff] %vm337_vm1, %v2304_v0  ;;  %511 = vst.msk [vmem:[#allocation5 + $0x78] sm:$0xff] %vm337_vm1, %v2304_v0  ;;  %v330_v4 = vld [vmem:[%s2541_s30] sm:$0xf]  ;;  %517 = vperm.xlu0 %2018, %v514_v8   ;;  %s1901_s10 = sshll.u32 %s1753_s9, 6  ;;  %s315_s14 = scalar_lea.vmem [#allocation9], %s1873_s20 }
  0x55   : > { %1908 = vmatpush3.msk.msra.mxu0 %vm341_vm2, %v330_v4  ;;  %464 = vst.msk [vmem:[#allocation3] sm:$0xff] %vm463_vm3, %v2307_v52  ;;  %465 = vst.msk [vmem:[#allocation3 + $0x8] sm:$0xff] %vm463_vm3, %v2307_v52  ;;  %s1757_s18 = sshll.u32 %s315_s14, 4  ;;  %s3098_s29 = scalar_lea.hbm %s3166_s6, %s1901_s10  ;;  %s3100_s18 = int_to_ptr.vmem [resolvable:$true] %s1757_s18 }
  0x56   : > { %1910 = vmatmul.mubr.msk.f32.vlgmr.msra.gmra.mrb[0].mxu0 %vm337_vm1, %v329_v2  ;;  %466 = vst.msk [vmem:[#allocation3 + $0x10] sm:$0xff] %vm463_vm3, %v2307_v52  ;;  %467 = vst.msk [vmem:[#allocation3 + $0x18] sm:$0xff] %vm463_vm3, %v2307_v52  ;;  %s1742_s16 = scalar_lea.sflag [#allocation8], %s313_s1  ;;  %s2179_s28 = scalar_lea.vmem %s3100_s18, 64 }
  0x57   : > { %736 = vmatprep.mubr.f32.mxu0 %v2304_v0  ;;  %468 = vst.msk [vmem:[#allocation3 + $0x20] sm:$0xff] %vm463_vm3, %v2307_v52  ;;  %469 = vst.msk [vmem:[#allocation3 + $0x28] sm:$0xff] %vm463_vm3, %v2307_v52  ;;  %p2180_p7 = scmp.ne.s32.totalorder %s3100_s18, %s2179_s28  ;;  %p3237_p4 = scmp.ne.s32.totalorder %s3191_s19, 0 }
  0x58   : > { %470 = vst.msk [vmem:[#allocation3 + $0x30] sm:$0xff] %vm463_vm3, %v2307_v52  ;;  %471 = vst.msk [vmem:[#allocation3 + $0x38] sm:$0xff] %vm463_vm3, %v2307_v52  ;;  %s2308_s27 = smov [#allocation9]  }
  0x59   : > { %472 = vst.msk [vmem:[#allocation3 + $0x40] sm:$0xff] %vm463_vm3, %v2307_v52  ;;  %473 = vst.msk [vmem:[#allocation3 + $0x48] sm:$0xff] %vm463_vm3, %v2307_v52  ;;  %p2181_p11 = pnand %p2180_p7, %p3237_p4 }
  0x5a   : > { %474 = vst.msk [vmem:[#allocation3 + $0x50] sm:$0xff] %vm463_vm3, %v2307_v52  ;;  %475 = vst.msk [vmem:[#allocation3 + $0x58] sm:$0xff] %vm463_vm3, %v2307_v52 }
  0x5b   : > { %476 = vst.msk [vmem:[#allocation3 + $0x60] sm:$0xff] %vm463_vm3, %v2307_v52  ;;  %477 = vst.msk [vmem:[#allocation3 + $0x68] sm:$0xff] %vm463_vm3, %v2307_v52  ;;  %p2182_p1 = pneg %p2181_p11 }
  0x5c   : > { %478 = vst.msk [vmem:[#allocation3 + $0x70] sm:$0xff] %vm463_vm3, %v2307_v52  ;;  %479 = vst.msk [vmem:[#allocation3 + $0x78] sm:$0xff] %vm463_vm3, %v2307_v52 }
  0x5d   : > { %480 = vst.msk [vmem:[#allocation4] sm:$0xff] %vm463_vm3, %v2304_v0  ;;  %481 = vst.msk [vmem:[#allocation4 + $0x8] sm:$0xff] %vm463_vm3, %v2304_v0 }
  0x5e   : > { %482 = vst.msk [vmem:[#allocation4 + $0x10] sm:$0xff] %vm463_vm3, %v2304_v0  ;;  %483 = vst.msk [vmem:[#allocation4 + $0x18] sm:$0xff] %vm463_vm3, %v2304_v0 }
  0x5f   : > { %484 = vst.msk [vmem:[#allocation4 + $0x20] sm:$0xff] %vm463_vm3, %v2304_v0  ;;  %485 = vst.msk [vmem:[#allocation4 + $0x28] sm:$0xff] %vm463_vm3, %v2304_v0 }
  0x60   : > { %486 = vst.msk [vmem:[#allocation4 + $0x30] sm:$0xff] %vm463_vm3, %v2304_v0  ;;  %487 = vst.msk [vmem:[#allocation4 + $0x38] sm:$0xff] %vm463_vm3, %v2304_v0 }
  0x61   : > { %488 = vst.msk [vmem:[#allocation4 + $0x40] sm:$0xff] %vm463_vm3, %v2304_v0  ;;  %489 = vst.msk [vmem:[#allocation4 + $0x48] sm:$0xff] %vm463_vm3, %v2304_v0 }
  0x62   : > { %490 = vst.msk [vmem:[#allocation4 + $0x50] sm:$0xff] %vm463_vm3, %v2304_v0  ;;  %491 = vst.msk [vmem:[#allocation4 + $0x58] sm:$0xff] %vm463_vm3, %v2304_v0 }
  0x63   : > { %492 = vst.msk [vmem:[#allocation4 + $0x60] sm:$0xff] %vm463_vm3, %v2304_v0  ;;  %493 = vst.msk [vmem:[#allocation4 + $0x68] sm:$0xff] %vm463_vm3, %v2304_v0 }
  0x64   : > { %494 = vst.msk [vmem:[#allocation4 + $0x70] sm:$0xff] %vm463_vm3, %v2304_v0  ;;  %495 = vst.msk [vmem:[#allocation4 + $0x78] sm:$0xff] %vm463_vm3, %v2304_v0 }
  0xcf   : > { %v335_v9 = vpop.permute.xlu0 %334 }
  0xd3   : > { %v518_v13 = vpop.permute.xlu0 %517 }
 0x126   : > { %v597_v14 = vpop.f32.mrb[0].mxu1 }
 0x127   : > { %v598_v15 = vadd.f32 %v597_v14, %v518_v13  ;;  %v599_v16 = vpop.f32.mrb[1].mxu1 }
 0x128   : > { %v600_v17 = vadd.f32 %v599_v16, %v518_v13 }
 0x129   : > { %v411_v10 = vpop.f32.mrb[0].mxu0  ;;  %v1362_v19 = vrot.slane %v598_v15, 4 }
 0x12a   : > { %v1911_v11 = vpop.f32.mrb[1].mxu0  ;;  %v412_v12 = vadd.f32 %v411_v10, %v335_v9  ;;  %v1363_v18 = vrot.slane %v600_v17, 4  ;;  %1881 = vmatprep.subr.msk.mxu0 %vm341_vm2, %v600_v17 }
 0x12b   : > { %1882 = vmatpush1.msk.msra.mxu0 %vm341_vm2, %v598_v15 }
 0x12c   : > { %415 = vxpose.xlu1.b32.start.end [1/1] (short) %v412_v12, 128  ;;  %1366 = vmatprep.subr.mxu1 %v1363_v18 }
 0x12d   : > { %1367 = vmatpush1.xpose.msra.mxu1 %v1362_v19 }
 0x14a   : > { %2019 = vset.pattern.permute.xlu1 %v2306_v1 }
 0x1ac   : > { %v431_v20 = vpop.trf.xlu1 }
 0x1ad   : > { %447 = vst.msk [vmem:[#allocation2] sm:$0xff] %vm337_vm1, %v431_v20 }
 0x1b0   : > { %v432_v21 = vpop.trf.xlu1 }
 0x1b1   : > { %448 = vst.msk [vmem:[#allocation2 + $0x8] sm:$0xff] %vm337_vm1, %v432_v21 }
 0x1b4   : > { %v433_v22 = vpop.trf.xlu1  ;;  %v602_v23 = vld [vmem:[#allocation2] sm:$0xff] }
 0x1b5   : > { %449 = vst.msk [vmem:[#allocation2 + $0x10] sm:$0xff] %vm337_vm1, %v433_v22  ;;  %1883 = vmatmul.mubr.msk.f32.vlgmr.msra.gmra.mrb[2].mxu0 %vm337_vm1, %v602_v23 }
 0x1b6   : > { %742 = vmatprep.mubr.f32.mxu0 %v2304_v0 }
 0x1b8   : > { %v434_v24 = vpop.trf.xlu1  ;;  %v603_v25 = vld [vmem:[#allocation2 + $0x8] sm:$0xff] }
 0x1b9   : > { %450 = vst.msk [vmem:[#allocation2 + $0x18] sm:$0xff] %vm337_vm1, %v434_v24  ;;  %1884 = vmatmul.mubr.msk.f32.gmra.mrb[4].mxu0 %vm337_vm1, %v603_v25 }
 0x1ba   : > { %748 = vmatprep.mubr.f32.mxu0 %v2304_v0 }
 0x1bc   : > { %v435_v26 = vpop.trf.xlu1  ;;  %v604_v27 = vld [vmem:[#allocation2 + $0x10] sm:$0xff] }
 0x1bd   : > { %451 = vst.msk [vmem:[#allocation2 + $0x20] sm:$0xff] %vm337_vm1, %v435_v26  ;;  %1885 = vmatmul.mubr.msk.f32.gmra.mrb[6].mxu0 %vm337_vm1, %v604_v27 }
 0x1be   : > { %754 = vmatprep.mubr.f32.mxu0 %v2304_v0 }
 0x1c0   : > { %v436_v28 = vpop.trf.xlu1  ;;  %v605_v29 = vld [vmem:[#allocation2 + $0x18] sm:$0xff] }
 0x1c1   : > { %452 = vst.msk [vmem:[#allocation2 + $0x28] sm:$0xff] %vm337_vm1, %v436_v28  ;;  %1886 = vmatmul.mubr.msk.f32.gmra.mrb[8].mxu0 %vm337_vm1, %v605_v29 }
 0x1c2   : > { %760 = vmatprep.mubr.f32.mxu0 %v2304_v0 }
 0x1c4   : > { %v437_v30 = vpop.trf.xlu1  ;;  %v606_v31 = vld [vmem:[#allocation2 + $0x20] sm:$0xff] }
 0x1c5   : > { %453 = vst.msk [vmem:[#allocation2 + $0x30] sm:$0xff] %vm337_vm1, %v437_v30  ;;  %1887 = vmatmul.mubr.msk.f32.gmra.mrb[10].mxu0 %vm337_vm1, %v606_v31 }
 0x1c6   : > { %766 = vmatprep.mubr.f32.mxu0 %v2304_v0 }
 0x1c8   : > { %v438_v32 = vpop.trf.xlu1  ;;  %v607_v33 = vld [vmem:[#allocation2 + $0x28] sm:$0xff] }
 0x1c9   : > { %454 = vst.msk [vmem:[#allocation2 + $0x38] sm:$0xff] %vm337_vm1, %v438_v32  ;;  %1888 = vmatmul.mubr.msk.f32.gmra.mrb[12].mxu0 %vm337_vm1, %v607_v33 }
 0x1ca   : > { %772 = vmatprep.mubr.f32.mxu0 %v2304_v0 }
 0x1cc   : > { %v439_v34 = vpop.trf.xlu1  ;;  %v608_v35 = vld [vmem:[#allocation2 + $0x30] sm:$0xff] }
 0x1cd   : > { %455 = vst.msk [vmem:[#allocation2 + $0x40] sm:$0xff] %vm337_vm1, %v439_v34  ;;  %1889 = vmatmul.mubr.msk.f32.gmra.mrb[14].mxu0 %vm337_vm1, %v608_v35 }
 0x1ce   : > { %778 = vmatprep.mubr.f32.mxu0 %v2304_v0 }
 0x1d0   : > { %v440_v36 = vpop.trf.xlu1  ;;  %v609_v37 = vld [vmem:[#allocation2 + $0x38] sm:$0xff] }
 0x1d1   : > { %456 = vst.msk [vmem:[#allocation2 + $0x48] sm:$0xff] %vm337_vm1, %v440_v36  ;;  %1890 = vmatmul.mubr.msk.f32.gmra.mrb[16].mxu0 %vm337_vm1, %v609_v37  ;;  %v2757_v37 = vld [vmem:[#allocation3] sm:$0xff] }
 0x1d2   : > { %784 = vmatprep.mubr.f32.mxu0 %v2304_v0 }
 0x1d4   : > { %v441_v38 = vpop.trf.xlu1  ;;  %v610_v39 = vld [vmem:[#allocation2 + $0x40] sm:$0xff] }
 0x1d5   : > { %457 = vst.msk [vmem:[#allocation2 + $0x50] sm:$0xff] %vm337_vm1, %v441_v38  ;;  %1891 = vmatmul.mubr.msk.f32.gmra.mrb[18].mxu0 %vm337_vm1, %v610_v39 }
 0x1d6   : > { %790 = vmatprep.mubr.f32.mxu0 %v2304_v0 }
 0x1d8   : > { %v442_v40 = vpop.trf.xlu1  ;;  %v611_v41 = vld [vmem:[#allocation2 + $0x48] sm:$0xff] }
 0x1d9   : > { %458 = vst.msk [vmem:[#allocation2 + $0x58] sm:$0xff] %vm337_vm1, %v442_v40  ;;  %1892 = vmatmul.mubr.msk.f32.gmra.mrb[20].mxu0 %vm337_vm1, %v611_v41  ;;  %v2762_v40 = vld [vmem:[#allocation3 + $0x8] sm:$0xff] }
 0x1da   : > { %796 = vmatprep.mubr.f32.mxu0 %v2304_v0 }
 0x1dc   : > { %v443_v42 = vpop.trf.xlu1  ;;  %v612_v43 = vld [vmem:[#allocation2 + $0x50] sm:$0xff] }
 0x1dd   : > { %459 = vst.msk [vmem:[#allocation2 + $0x60] sm:$0xff] %vm337_vm1, %v443_v42  ;;  %1893 = vmatmul.mubr.msk.f32.gmra.mrb[22].mxu0 %vm337_vm1, %v612_v43  ;;  %v2770_v43 = vld [vmem:[#allocation3 + $0x10] sm:$0xff] }
 0x1de   : > { %802 = vmatprep.mubr.f32.mxu0 %v2304_v0 }
 0x1e0   : > { %v444_v44 = vpop.trf.xlu1  ;;  %v613_v45 = vld [vmem:[#allocation2 + $0x58] sm:$0xff] }
 0x1e1   : > { %460 = vst.msk [vmem:[#allocation2 + $0x68] sm:$0xff] %vm337_vm1, %v444_v44  ;;  %1894 = vmatmul.mubr.msk.f32.gmra.mrb[24].mxu0 %vm337_vm1, %v613_v45 }
 0x1e2   : > { %808 = vmatprep.mubr.f32.mxu0 %v2304_v0 }
 0x1e4   : > { %v445_v46 = vpop.trf.xlu1  ;;  %v614_v47 = vld [vmem:[#allocation2 + $0x60] sm:$0xff] }
 0x1e5   : > { %461 = vst.msk [vmem:[#allocation2 + $0x70] sm:$0xff] %vm337_vm1, %v445_v46  ;;  %1895 = vmatmul.mubr.msk.f32.gmra.mrb[26].mxu0 %vm337_vm1, %v614_v47  ;;  %v2780_v47 = vld [vmem:[#allocation3 + $0x18] sm:$0xff] }
 0x1e6   : > { %814 = vmatprep.mubr.f32.mxu0 %v2304_v0 }
 0x1e8   : > { %v446_v48 = vpop.trf.xlu1  ;;  %v615_v49 = vld [vmem:[#allocation2 + $0x68] sm:$0xff] }
 0x1e9   : > { %462 = vst.msk [vmem:[#allocation2 + $0x78] sm:$0xff] %vm337_vm1, %v446_v48  ;;  %1896 = vmatmul.mubr.msk.f32.gmra.mrb[28].mxu0 %vm337_vm1, %v615_v49 }
 0x1ea   : > { %820 = vmatprep.mubr.f32.mxu0 %v2304_v0 }
 0x1ec   : > { %v616_v50 = vld [vmem:[#allocation2 + $0x70] sm:$0xff] }
 0x1ed   : > { %1897 = vmatmul.mubr.msk.f32.gmra.mrb[30].mxu0 %vm337_vm1, %v616_v50 }
 0x1ee   : > { %826 = vmatprep.mubr.f32.mxu0 %v2304_v0 }
 0x1f0   : > { %v617_v51 = vld [vmem:[#allocation2 + $0x78] sm:$0xff] }
 0x1f1   : > { %1898 = vmatmul.mubr.msk.f32.gmra.mrb[32].mxu0 %vm337_vm1, %v617_v51  ;;  %v2790_v51 = vld [vmem:[#allocation3 + $0x20] sm:$0xff] }
 0x288   : > { %v2661_v53 = vpop.f32.mrb[2].mxu0 }
 0x289   : > { %v2663_v54 = vpop.f32.mrb[3].mxu0 }
 0x28a   : > { %v849_v55 = vmax.f32 %v2661_v53, %v2663_v54 }
 0x28c   : > { %850 = vmax.xlane.f32.xlu1 %v849_v55  ;;  %v2667_v56 = vpop.f32.mrb[4].mxu0 }
 0x28d   : > { %v2669_v57 = vpop.f32.mrb[5].mxu0 }
 0x28e   : > { %v852_v58 = vmax.f32 %v2667_v56, %v2669_v57 }
 0x290   : > { %853 = vmax.xlane.f32.xlu0 %v852_v58  ;;  %v2673_v59 = vpop.f32.mrb[6].mxu0 }
 0x291   : > { %v2675_v60 = vpop.f32.mrb[7].mxu0 }
 0x292   : > { %v855_v61 = vmax.f32 %v2673_v59, %v2675_v60 }
 0x294   : > { %856 = vmax.xlane.f32.xlu0 %v855_v61  ;;  %v2679_v62 = vpop.f32.mrb[8].mxu0  ;;  %v2800_v61 = vld [vmem:[#allocation3 + $0x28] sm:$0xff] }
 0x295   : > { %v2681_v63 = vpop.f32.mrb[9].mxu0 }
 0x296   : > { %v858_v0 = vmax.f32 %v2679_v62, %v2681_v63 }
 0x298   : > { %859 = vmax.xlane.f32.xlu0 %v858_v0  ;;  %v2685_v1 = vpop.f32.mrb[10].mxu0 }
 0x299   : > { %v2687_v2 = vpop.f32.mrb[11].mxu0 }
 0x29a   : > { %v861_v3 = vmax.f32 %v2685_v1, %v2687_v2 }
 0x29c   : > { %862 = vmax.xlane.f32.xlu0 %v861_v3  ;;  %v2691_v4 = vpop.f32.mrb[12].mxu0 }
 0x29d   : > { %v2693_v5 = vpop.f32.mrb[13].mxu0 }
 0x29e   : > { %v864_v6 = vmax.f32 %v2691_v4, %v2693_v5 }
 0x2a0   : > { %865 = vmax.xlane.f32.xlu0 %v864_v6  ;;  %v2697_v7 = vpop.f32.mrb[14].mxu0 }
 0x2a1   : > { %v2699_v8 = vpop.f32.mrb[15].mxu0 }
 0x2a2   : > { %v867_v9 = vmax.f32 %v2697_v7, %v2699_v8 }
 0x2a4   : > { %868 = vmax.xlane.f32.xlu0 %v867_v9  ;;  %v2703_v10 = vpop.f32.mrb[16].mxu0  ;;  %v2810_v9 = vld [vmem:[#allocation3 + $0x30] sm:$0xff] }
 0x2a5   : > { %v2705_v11 = vpop.f32.mrb[17].mxu0 }
 0x2a6   : > { %v870_v12 = vmax.f32 %v2703_v10, %v2705_v11 }
 0x2a8   : > { %871 = vmax.xlane.f32.xlu0 %v870_v12  ;;  %v2709_v13 = vpop.f32.mrb[18].mxu0  ;;  %v2860_v12 = vld [vmem:[#allocation3 + $0x58] sm:$0xff] }
 0x2a9   : > { %v2711_v14 = vpop.f32.mrb[19].mxu0  ;;  %3203 = vst [vmem:[#allocation22_spill] sm:$0xff] %v2860_v12 }
 0x2aa   : > { %v873_v15 = vmax.f32 %v2709_v13, %v2711_v14 }
 0x2ac   : > { %874 = vmax.xlane.f32.xlu0 %v873_v15  ;;  %v2715_v16 = vpop.f32.mrb[20].mxu0 }
 0x2ad   : > { %v2717_v17 = vpop.f32.mrb[21].mxu0 }
 0x2ae   : > { %v876_v18 = vmax.f32 %v2715_v16, %v2717_v17 }
 0x2b0   : > { %877 = vmax.xlane.f32.xlu0 %v876_v18  ;;  %v2721_v19 = vpop.f32.mrb[22].mxu0 }
 0x2b1   : > { %v2723_v20 = vpop.f32.mrb[23].mxu0 }
 0x2b2   : > { %v879_v21 = vmax.f32 %v2721_v19, %v2723_v20 }
 0x2b4   : > { %880 = vmax.xlane.f32.xlu0 %v879_v21  ;;  %v2727_v22 = vpop.f32.mrb[24].mxu0  ;;  %v2820_v21 = vld [vmem:[#allocation3 + $0x38] sm:$0xff] }
 0x2b5   : > { %v2729_v23 = vpop.f32.mrb[25].mxu0  ;;  %3199 = vst [vmem:[#allocation18_spill] sm:$0xff] %v2820_v21 }
 0x2b6   : > { %v882_v24 = vmax.f32 %v2727_v22, %v2729_v23 }
 0x2b8   : > { %883 = vmax.xlane.f32.xlu0 %v882_v24  ;;  %v2733_v25 = vpop.f32.mrb[26].mxu0 }
 0x2b9   : > { %v2735_v26 = vpop.f32.mrb[27].mxu0 }
 0x2ba   : > { %v885_v27 = vmax.f32 %v2733_v25, %v2735_v26 }
 0x2bc   : > { %886 = vmax.xlane.f32.xlu0 %v885_v27  ;;  %v2739_v28 = vpop.f32.mrb[28].mxu0 }
 0x2bd   : > { %v2741_v29 = vpop.f32.mrb[29].mxu0 }
 0x2be   : > { %v888_v30 = vmax.f32 %v2739_v28, %v2741_v29 }
 0x2c0   : > { %889 = vmax.xlane.f32.xlu0 %v888_v30  ;;  %v2745_v31 = vpop.f32.mrb[30].mxu0 }
 0x2c1   : > { %v2747_v32 = vpop.f32.mrb[31].mxu0 }
 0x2c2   : > { %v891_v33 = vmax.f32 %v2745_v31, %v2747_v32 }
 0x2c4   : > { %892 = vmax.xlane.f32.xlu0 %v891_v33  ;;  %v2751_v34 = vpop.f32.mrb[32].mxu0  ;;  %v2830_v33 = vld [vmem:[#allocation3 + $0x40] sm:$0xff] }
 0x2c5   : > { %v2753_v35 = vpop.f32.mrb[33].mxu0 }
 0x2c6   : > { %v894_v36 = vmax.f32 %v2751_v34, %v2753_v35 }
 0x2c8   : > { %895 = vmax.xlane.f32.xlu0 %v894_v36 }
 0x319   : > { %v851_v38 = vpop.xlane.xlu1 %850 }
 0x31a   : > { %v2760_v39 = vmax.f32 %v2757_v37, %v851_v38 }
 0x31c   : > { %1543 = vst.msk [vmem:[#allocation3] sm:$0xff] %vm463_vm3, %v2760_v39  ;;  %963 = vperm.xlu0 %2018, %v2760_v39  }
 0x31d   : > { %v854_v41 = vpop.xlane.xlu0 %853 }
 0x31e   : > { %v2768_v42 = vmax.f32 %v2762_v40, %v854_v41 }
 0x320   : > { %1544 = vst.msk [vmem:[#allocation3 + $0x8] sm:$0xff] %vm463_vm3, %v2768_v42  ;;  %968 = vperm.xlu1 %2019, %v2768_v42  }
 0x321   : > { %v857_v45 = vpop.xlane.xlu0 %856 }
 0x322   : > { %v2778_v46 = vmax.f32 %v2770_v43, %v857_v45  ;;  %v2840_v45 = vld [vmem:[#allocation3 + $0x48] sm:$0xff] }
 0x323   : > { %3201 = vst [vmem:[#allocation20_spill] sm:$0xff] %v2840_v45 }
 0x324   : > { %1545 = vst.msk [vmem:[#allocation3 + $0x10] sm:$0xff] %vm463_vm3, %v2778_v46  ;;  %973 = vperm.xlu0 %2018, %v2778_v46  }
 0x325   : > { %v860_v49 = vpop.xlane.xlu0 %859 }
 0x326   : > { %v2788_v50 = vmax.f32 %v2780_v47, %v860_v49  ;;  %v2872_v49 = vld [vmem:[#allocation3 + $0x60] sm:$0xff] }
 0x328   : > { %1546 = vst.msk [vmem:[#allocation3 + $0x18] sm:$0xff] %vm463_vm3, %v2788_v50  ;;  %978 = vperm.xlu1 %2019, %v2788_v50  }
 0x329   : > { %v863_v55 = vpop.xlane.xlu0 %862 }
 0x32a   : > { %v2798_v58 = vmax.f32 %v2790_v51, %v863_v55 }
 0x32c   : > { %1547 = vst.msk [vmem:[#allocation3 + $0x20] sm:$0xff] %vm463_vm3, %v2798_v58  ;;  %983 = vperm.xlu0 %2018, %v2798_v58  }
 0x32d   : > { %v866_v3 = vpop.xlane.xlu0 %865 }
 0x32e   : > { %v2808_v6 = vmax.f32 %v2800_v61, %v866_v3 }
 0x330   : > { %3198 = vst [vmem:[#allocation17_spill] sm:$0xff] %v2808_v6  ;;  %1548 = vst.msk [vmem:[#allocation3 + $0x28] sm:$0xff] %vm463_vm3, %v2808_v6  ;;  %988 = vperm.xlu1 %2019, %v2808_v6  }
 0x331   : > { %v869_v15 = vpop.xlane.xlu0 %868 }
 0x332   : > { %v2818_v18 = vmax.f32 %v2810_v9, %v869_v15  ;;  %v2850_v15 = vld [vmem:[#allocation3 + $0x50] sm:$0xff] }
 0x334   : > { %1549 = vst.msk [vmem:[#allocation3 + $0x30] sm:$0xff] %vm463_vm3, %v2818_v18  ;;  %993 = vperm.xlu0 %2018, %v2818_v18  }
 0x335   : > { %v872_v27 = vpop.xlane.xlu0 %871 }
 0x336   : > { %v2828_v30 = vmax.f32 %v2820_v21, %v872_v27  ;;  %v913_v27 = vsub.f32 %v2757_v37, %v2760_v39  ;;  %v2882_v37 = vld [vmem:[#allocation3 + $0x68] sm:$0xff] }
 0x338   : > { %3200 = vst [vmem:[#allocation19_spill] sm:$0xff] %v2828_v30  ;;  %1550 = vst.msk [vmem:[#allocation3 + $0x38] sm:$0xff] %vm463_vm3, %v2828_v30  ;;  %998 = vperm.xlu1 %2019, %v2828_v30  }
 0x339   : > { %v875_v38 = vpop.xlane.xlu0 %874 }
 0x33a   : > { %v2838_v41 = vmax.f32 %v2830_v33, %v875_v38 }
 0x33c   : > { %1551 = vst.msk [vmem:[#allocation3 + $0x40] sm:$0xff] %vm463_vm3, %v2838_v41  ;;  %1003 = vperm.xlu0 %2018, %v2838_v41  }
 0x33d   : > { %v878_v55 = vpop.xlane.xlu0 %877 }
 0x33e   : > { %v2848_v3 = vmax.f32 %v2840_v45, %v878_v55  ;;  %v929_v55 = vmul.f32 1.442695, %v913_v27  ;;  %v2892_v27 = vld [vmem:[#allocation3 + $0x70] sm:$0xff] }
 0x33f   : > { %3205 = vst [vmem:[#allocation24_spill] sm:$0xff] %v2892_v27 }
 0x340   : > { %3202 = vst [vmem:[#allocation21_spill] sm:$0xff] %v2848_v3  ;;  %1552 = vst.msk [vmem:[#allocation3 + $0x48] sm:$0xff] %vm463_vm3, %v2848_v3  ;;  %1008 = vperm.xlu1 %2019, %v2848_v3   ;;  %2021 = vpow2.f32 %v929_v55 }
 0x341   : > { %v881_v38 = vpop.xlane.xlu0 %880 }
 0x342   : > { %v2858_v36 = vmax.f32 %v2850_v15, %v881_v38 }
 0x344   : > { %1553 = vst.msk [vmem:[#allocation3 + $0x50] sm:$0xff] %vm463_vm3, %v2858_v36  ;;  %1013 = vperm.xlu0 %2018, %v2858_v36  }
 0x345   : > { %v884_v52 = vpop.xlane.xlu0 %883 }
 0x346   : > { %v2870_v48 = vmax.f32 %v2860_v12, %v884_v52 }
 0x348   : > { %3204 = vst [vmem:[#allocation23_spill] sm:$0xff] %v2870_v48  ;;  %1554 = vst.msk [vmem:[#allocation3 + $0x58] sm:$0xff] %vm463_vm3, %v2870_v48  ;;  %1018 = vperm.xlu1 %2019, %v2870_v48   ;;  %v2902_v48 = vld [vmem:[#allocation3 + $0x78] sm:$0xff] }
 0x349   : > { %v887_v24 = vpop.xlane.xlu0 %886  ;;  %3207 = vst [vmem:[#allocation26_spill] sm:$0xff] %v2902_v48 }
 0x34a   : > { %v2880_v0 = vmax.f32 %v2872_v49, %v887_v24  ;;  %v2912_v12 = vpop.eup %2021 }
 0x34b   : > { %3209 = vst [vmem:[#allocation28_spill] sm:$0xff] %v2912_v12 }
 0x34c   : > { %1555 = vst.msk [vmem:[#allocation3 + $0x60] sm:$0xff] %vm463_vm3, %v2880_v0  ;;  %1023 = vperm.xlu0 %2018, %v2880_v0  }
 0x34d   : > { %v890_v52 = vpop.xlane.xlu0 %889 }
 0x34e   : > { %v2890_v38 = vmax.f32 %v2882_v37, %v890_v52 }
 0x350   : > { %1556 = vst.msk [vmem:[#allocation3 + $0x68] sm:$0xff] %vm463_vm3, %v2890_v38  ;;  %1028 = vperm.xlu1 %2019, %v2890_v38  }
 0x351   : > { %v893_v39 = vpop.xlane.xlu0 %892 }
 0x352   : > { %v2900_v44 = vmax.f32 %v2892_v27, %v893_v39 }
 0x354   : > { %3206 = vst [vmem:[#allocation25_spill] sm:$0xff] %v2900_v44  ;;  %1557 = vst.msk [vmem:[#allocation3 + $0x70] sm:$0xff] %vm463_vm3, %v2900_v44  ;;  %1033 = vperm.xlu0 %2018, %v2900_v44  }
 0x355   : > { %v896_v52 = vpop.xlane.xlu0 %895 }
 0x356   : > { %v2910_v24 = vmax.f32 %v2902_v48, %v896_v52 }
 0x358   : > { %3208 = vst [vmem:[#allocation27_spill] sm:$0xff] %v2910_v24  ;;  %1558 = vst.msk [vmem:[#allocation3 + $0x78] sm:$0xff] %vm463_vm3, %v2910_v24  ;;  %1268 = vperm.xlu0 %2018, %v2912_v12   ;;  %1038 = vperm.xlu1 %2019, %v2910_v24  }
 0x39b   : > { %v964_v55 = vpop.permute.xlu0 %963 }
 0x39c   : > { %v1041_v3 = vsub.f32 %v2661_v53, %v964_v55  ;;  %v1042_v45 = vsub.f32 %v2663_v54, %v964_v55 }
 0x39e   : > { %v1073_v30 = vmul.f32 1.442695, %v1041_v3  ;;  %v1075_v52 = vmul.f32 1.442695, %v1042_v45 }
 0x39f   : > { %v969_v21 = vpop.permute.xlu1 %968 }
 0x3a0   : > { %2023 = vpow2.f32 %v1073_v30  ;;  %v1043_v44 = vsub.f32 %v2667_v56, %v969_v21  ;;  %v1044_v39 = vsub.f32 %v2669_v57, %v969_v21 }
 0x3a1   : > { %2025 = vpow2.f32 %v1075_v52 }
 0x3a2   : > { %v1077_v48 = vmul.f32 1.442695, %v1043_v44  ;;  %v1079_v27 = vmul.f32 1.442695, %v1044_v39 }
 0x3a3   : > { %v974_v6 = vpop.permute.xlu0 %973 }
 0x3a4   : > { %2027 = vpow2.f32 %v1077_v48  ;;  %v1045_v12 = vsub.f32 %v2673_v59, %v974_v6  ;;  %v1046_v24 = vsub.f32 %v2675_v60, %v974_v6 }
 0x3a5   : > { %2029 = vpow2.f32 %v1079_v27 }
 0x3a6   : > { %v1081_v53 = vmul.f32 1.442695, %v1045_v12  ;;  %v1083_v54 = vmul.f32 1.442695, %v1046_v24 }
 0x3a7   : > { %v979_v3 = vpop.permute.xlu1 %978 }
 0x3a8   : > { %2031 = vpow2.f32 %v1081_v53  ;;  %v1047_v30 = vsub.f32 %v2679_v62, %v979_v3  ;;  %v1048_v56 = vsub.f32 %v2681_v63, %v979_v3  ;;  %v3210_v3 = vsub.f32 %v2762_v40, %v2768_v42 }
 0x3a9   : > { %2033 = vpow2.f32 %v1083_v54 }
 0x3aa   : > { %v2024_v57 = vpop.eup %2023  ;;  %v1085_v21 = vmul.f32 1.442695, %v1047_v30  ;;  %v1087_v44 = vmul.f32 1.442695, %v1048_v56  ;;  %v931_v30 = vmul.f32 1.442695, %v3210_v3 }
 0x3ab   : > { %v2026_v45 = vpop.eup %2025  ;;  %v984_v55 = vpop.permute.xlu0 %983 }
 0x3ac   : > { %2035 = vpow2.f32 %v1085_v21  ;;  %1430 = vmatprep.mubr.f32.mxu1 %v2026_v45  ;;  %v1049_v59 = vsub.f32 %v2685_v1, %v984_v55  ;;  %v1050_v60 = vsub.f32 %v2687_v2, %v984_v55  ;;  %v1169_v48 = vadd.f32 %v2026_v45, %v2024_v57 }
 0x3ad   : > { %2037 = vpow2.f32 %v1087_v44  ;;  %1431 = vmatmul.mubr.f32.vlgmr.msra.gmra.mrb[2].mxu1 %v2024_v57 }
 0x3ae   : > { %v2028_v6 = vpop.eup %2027  ;;  %v1089_v12 = vmul.f32 1.442695, %v1049_v59  ;;  %v1091_v62 = vmul.f32 1.442695, %v1050_v60  ;;  %1170 = vadd.xlane.f32.xlu0 %v1169_v48 }
 0x3af   : > { %v2030_v63 = vpop.eup %2029  ;;  %v989_v27 = vpop.permute.xlu1 %988 }
 0x3b0   : > { %2039 = vpow2.f32 %v1089_v12  ;;  %v1051_v24 = vsub.f32 %v2691_v4, %v989_v27  ;;  %v1052_v39 = vsub.f32 %v2693_v5, %v989_v27  ;;  %1435 = vmatprep.mubr.f32.mxu1 %v2030_v63  ;;  %v1172_v52 = vadd.f32 %v2030_v63, %v2028_v6 }
 0x3b1   : > { %2041 = vpow2.f32 %v1091_v62  ;;  %1436 = vmatmul.mubr.f32.gmra.mrb[4].mxu1 %v2028_v6 }
 0x3b2   : > { %v2032_v1 = vpop.eup %2031  ;;  %v1093_v2 = vmul.f32 1.442695, %v1051_v24  ;;  %v1095_v53 = vmul.f32 1.442695, %v1052_v39  ;;  %1173 = vadd.xlane.f32.xlu1 %v1172_v52 }
 0x3b3   : > { %v2034_v54 = vpop.eup %2033  ;;  %v994_v56 = vpop.permute.xlu0 %993 }
 0x3b4   : > { %2043 = vpow2.f32 %v1093_v2  ;;  %1440 = vmatprep.mubr.f32.mxu1 %v2034_v54  ;;  %v1053_v4 = vsub.f32 %v2697_v7, %v994_v56  ;;  %v1054_v5 = vsub.f32 %v2699_v8, %v994_v56  ;;  %v1175_v57 = vadd.f32 %v2034_v54, %v2032_v1 }
 0x3b5   : > { %2045 = vpow2.f32 %v1095_v53  ;;  %1441 = vmatmul.mubr.f32.gmra.mrb[6].mxu1 %v2032_v1 }
 0x3b6   : > { %v2036_v21 = vpop.eup %2035  ;;  %v1097_v44 = vmul.f32 1.442695, %v1053_v4  ;;  %v1099_v45 = vmul.f32 1.442695, %v1054_v5  ;;  %1176 = vadd.xlane.f32.xlu0 %v1175_v57  ;;  %2047 = vpow2.f32 %v931_v30 }
 0x3b7   : > { %v2038_v55 = vpop.eup %2037  ;;  %v999_v59 = vpop.permute.xlu1 %998 }
 0x3b8   : > { %2049 = vpow2.f32 %v1097_v44  ;;  %v1055_v40 = vsub.f32 %v2703_v10, %v999_v59  ;;  %v1056_v42 = vsub.f32 %v2705_v11, %v999_v59  ;;  %1445 = vmatprep.mubr.f32.mxu1 %v2038_v55  ;;  %v1178_v60 = vadd.f32 %v2038_v55, %v2036_v21 }
 0x3b9   : > { %2051 = vpow2.f32 %v1099_v45  ;;  %1446 = vmatmul.mubr.f32.gmra.mrb[8].mxu1 %v2036_v21 }
 0x3ba   : > { %v2040_v7 = vpop.eup %2039  ;;  %v1101_v8 = vmul.f32 1.442695, %v1055_v40  ;;  %v1103_v48 = vmul.f32 1.442695, %v1056_v42  ;;  %1179 = vadd.xlane.f32.xlu0 %v1178_v60 }
 0x3bb   : > { %v2042_v6 = vpop.eup %2041  ;;  %v1004_v12 = vpop.permute.xlu0 %1003 }
 0x3bc   : > { %2053 = vpow2.f32 %v1101_v8  ;;  %1450 = vmatprep.mubr.f32.mxu1 %v2042_v6  ;;  %v1057_v62 = vsub.f32 %v2709_v13, %v1004_v12  ;;  %v1058_v63 = vsub.f32 %v2711_v14, %v1004_v12  ;;  %v1181_v27 = vadd.f32 %v2042_v6, %v2040_v7 }
 0x3bd   : > { %2055 = vpow2.f32 %v1103_v48  ;;  %1451 = vmatmul.mubr.f32.gmra.mrb[10].mxu1 %v2040_v7 }
 0x3be   : > { %v2044_v10 = vpop.eup %2043  ;;  %v1105_v11 = vmul.f32 1.442695, %v1057_v62  ;;  %v1107_v24 = vmul.f32 1.442695, %v1058_v63  ;;  %1182 = vadd.xlane.f32.xlu0 %v1181_v27 }
 0x3bf   : > { %v2046_v39 = vpop.eup %2045  ;;  %v1009_v52 = vpop.permute.xlu1 %1008 }
 0x3c0   : > { %2057 = vpow2.f32 %v1105_v11  ;;  %v1059_v1 = vsub.f32 %v2715_v16, %v1009_v52  ;;  %v1060_v2 = vsub.f32 %v2717_v17, %v1009_v52  ;;  %1455 = vmatprep.mubr.f32.mxu1 %v2046_v39  ;;  %v2943_v53 = vadd.f32 %v2046_v39, %v2044_v10  ;;  %v2945_v13 = vpop.eup %2047 }
 0x3c1   : > { %2059 = vpow2.f32 %v1107_v24  ;;  %1456 = vmatmul.mubr.f32.gmra.mrb[12].mxu1 %v2044_v10 }
 0x3c2   : > { %v2050_v14 = vpop.eup %2049  ;;  %v1109_v54 = vmul.f32 1.442695, %v1059_v1  ;;  %v1111_v3 = vmul.f32 1.442695, %v1060_v2 }
 0x3c3   : > { %v2052_v30 = vpop.eup %2051  ;;  %1273 = vperm.xlu1 %2019, %v2945_v13   ;;  %v1014_v56 = vpop.permute.xlu0 %1013 }
 0x3c4   : > { %2061 = vpow2.f32 %v1109_v54  ;;  %1460 = vmatprep.mubr.f32.mxu1 %v2052_v30  ;;  %v1061_v16 = vsub.f32 %v2721_v19, %v1014_v56  ;;  %v1062_v17 = vsub.f32 %v2723_v20, %v1014_v56  ;;  %v1187_v4 = vadd.f32 %v2052_v30, %v2050_v14 }
 0x3c5   : > { %2063 = vpow2.f32 %v1111_v3  ;;  %1461 = vmatmul.mubr.f32.gmra.mrb[14].mxu1 %v2050_v14 }
 0x3c6   : > { %v2054_v5 = vpop.eup %2053  ;;  %v1113_v57 = vmul.f32 1.442695, %v1061_v16  ;;  %v1115_v21 = vmul.f32 1.442695, %v1062_v17  ;;  %1188 = vadd.xlane.f32.xlu0 %v1187_v4 }
 0x3c7   : > { %v2056_v44 = vpop.eup %2055  ;;  %v1019_v45 = vpop.permute.xlu1 %1018 }
 0x3c8   : > { %2065 = vpow2.f32 %v1113_v57  ;;  %v1063_v55 = vsub.f32 %v2727_v22, %v1019_v45  ;;  %v1064_v59 = vsub.f32 %v2729_v23, %v1019_v45  ;;  %1465 = vmatprep.mubr.f32.mxu1 %v2056_v44  ;;  %v2952_v40 = vadd.f32 %v2056_v44, %v2054_v5 }
 0x3c9   : > { %2067 = vpow2.f32 %v1115_v21  ;;  %1466 = vmatmul.mubr.f32.gmra.mrb[16].mxu1 %v2054_v5 }
 0x3ca   : > { %v2058_v19 = vpop.eup %2057  ;;  %v1117_v20 = vmul.f32 1.442695, %v1063_v55  ;;  %v1119_v42 = vmul.f32 1.442695, %v1064_v59 }
 0x3cb   : > { %v2060_v60 = vpop.eup %2059  ;;  %v1024_v7 = vpop.permute.xlu0 %1023 }
 0x3cc   : > { %2069 = vpow2.f32 %v1117_v20  ;;  %1470 = vmatprep.mubr.f32.mxu1 %v2060_v60  ;;  %v1065_v8 = vsub.f32 %v2733_v25, %v1024_v7  ;;  %v1066_v48 = vsub.f32 %v2735_v26, %v1024_v7  ;;  %v1193_v6 = vadd.f32 %v2060_v60, %v2058_v19 }
 0x3cd   : > { %2071 = vpow2.f32 %v1119_v42  ;;  %1471 = vmatmul.mubr.f32.gmra.mrb[18].mxu1 %v2058_v19  ;;  %v3211_v42 = vsub.f32 %v2790_v51, %v2798_v58  ;;  %v3212_v7 = vsub.f32 %v2810_v9, %v2818_v18  ;;  %v3215_v58 = vsub.f32 %v2770_v43, %v2778_v46 }
 0x3ce   : > { %v2062_v22 = vpop.eup %2061  ;;  %v1121_v23 = vmul.f32 1.442695, %v1065_v8  ;;  %v1123_v12 = vmul.f32 1.442695, %v1066_v48  ;;  %1194 = vadd.xlane.f32.xlu0 %v1193_v6  ;;  %v3216_v18 = vsub.f32 %v2872_v49, %v2880_v0  ;;  %v3218_v43 = vsub.f32 %v2882_v37, %v2890_v38  ;;  %v3219_v0 = vld [vmem:[#allocation17_spill] sm:$0xff]  ;;  %v3225_v38 = vld [vmem:[#allocation19_spill] sm:$0xff] }
 0x3cf   : > { %v2064_v62 = vpop.eup %2063  ;;  %v1029_v63 = vpop.permute.xlu1 %1028  ;;  %v937_v60 = vmul.f32 1.442695, %v3211_v42  ;;  %v941_v8 = vmul.f32 1.442695, %v3212_v7  ;;  %v933_v9 = vmul.f32 1.442695, %v3215_v58  ;;  %v3220_v49 = vsub.f32 %v2800_v61, %v3219_v0 }
 0x3d0   : > { %2073 = vpow2.f32 %v1121_v23  ;;  %v1067_v27 = vsub.f32 %v2739_v28, %v1029_v63  ;;  %v1068_v10 = vsub.f32 %v2741_v29, %v1029_v63  ;;  %1475 = vmatprep.mubr.f32.mxu1 %v2064_v62  ;;  %v1196_v11 = vadd.f32 %v2064_v62, %v2062_v22  ;;  %v3228_v61 = vld [vmem:[#allocation27_spill] sm:$0xff]  ;;  %v1141_v58 = vld [vmem:[#allocation4 + $0x20] sm:$0xff] }
 0x3d1   : > { %2075 = vpow2.f32 %v1123_v12  ;;  %1476 = vmatmul.mubr.f32.gmra.mrb[20].mxu1 %v2062_v22  ;;  %v955_v46 = vmul.f32 1.442695, %v3218_v43  ;;  %v939_v23 = vmul.f32 1.442695, %v3220_v49  ;;  %v3221_v12 = vld [vmem:[#allocation24_spill] sm:$0xff] }
 0x3d2   : > { %v2066_v25 = vpop.eup %2065  ;;  %v1125_v26 = vmul.f32 1.442695, %v1067_v27  ;;  %v1127_v24 = vmul.f32 1.442695, %v1068_v10  ;;  %v3224_v27 = vld [vmem:[#allocation18_spill] sm:$0xff]  ;;  %v1143_v43 = vld [vmem:[#allocation4 + $0x30] sm:$0xff] }
 0x3d3   : > { %v2068_v39 = vpop.eup %2067  ;;  %v1034_v52 = vpop.permute.xlu0 %1033  ;;  %v3226_v37 = vsub.f32 %v3224_v27, %v3225_v38 }
 0x3d4   : > { %2077 = vpow2.f32 %v1125_v26  ;;  %1480 = vmatprep.mubr.f32.mxu1 %v2068_v39  ;;  %v1069_v1 = vsub.f32 %v2745_v31, %v1034_v52  ;;  %v1070_v2 = vsub.f32 %v2747_v32, %v1034_v52  ;;  %v1199_v14 = vadd.f32 %v2068_v39, %v2066_v25  ;;  %v3230_v52 = vld [vmem:[#allocation20_spill] sm:$0xff] }
 0x3d5   : > { %2079 = vpow2.f32 %v1127_v24  ;;  %1481 = vmatmul.mubr.f32.gmra.mrb[22].mxu1 %v2066_v25  ;;  %v943_v10 = vmul.f32 1.442695, %v3226_v37 }
 0x3d6   : > { %v2070_v28 = vpop.eup %2069  ;;  %v1129_v29 = vmul.f32 1.442695, %v1069_v1  ;;  %v1131_v54 = vmul.f32 1.442695, %v1070_v2  ;;  %1200 = vadd.xlane.f32.xlu0 %v1199_v14  ;;  %v3231_v1 = vld [vmem:[#allocation21_spill] sm:$0xff] }
 0x3d7   : > { %v2072_v3 = vpop.eup %2071  ;;  %v1039_v30 = vpop.permute.xlu1 %1038  ;;  %v3232_v2 = vsub.f32 %v3230_v52, %v3231_v1 }
 0x3d8   : > { %2081 = vpow2.f32 %v1129_v29  ;;  %v1071_v56 = vsub.f32 %v2751_v34, %v1039_v30  ;;  %v1072_v16 = vsub.f32 %v2753_v35, %v1039_v30  ;;  %1485 = vmatprep.mubr.f32.mxu1 %v2072_v3  ;;  %v1202_v31 = vadd.f32 %v2072_v3, %v2070_v28  ;;  %v3234_v3 = vld [vmem:[#allocation23_spill] sm:$0xff] }
 0x3d9   : > { %2083 = vpow2.f32 %v1131_v54  ;;  %1486 = vmatmul.mubr.f32.gmra.mrb[24].mxu1 %v2070_v28  ;;  %v947_v14 = vmul.f32 1.442695, %v3232_v2  ;;  %v3233_v54 = vld [vmem:[#allocation22_spill] sm:$0xff] }
 0x3da   : > { %v2074_v17 = vpop.eup %2073  ;;  %v1133_v32 = vmul.f32 1.442695, %v1071_v56  ;;  %v1135_v4 = vmul.f32 1.442695, %v1072_v16  ;;  %v3235_v30 = vsub.f32 %v3233_v54, %v3234_v3  ;;  %v1142_v54 = vld [vmem:[#allocation4 + $0x28] sm:$0xff] }
 0x3db   : > { %v2076_v5 = vpop.eup %2075 }
 0x3dc   : > { %2085 = vpow2.f32 %v1133_v32  ;;  %1490 = vmatprep.mubr.f32.mxu1 %v2076_v5  ;;  %v1205_v57 = vadd.f32 %v2076_v5, %v2074_v17  ;;  %v951_v56 = vmul.f32 1.442695, %v3235_v30 }
 0x3dd   : > { %2087 = vpow2.f32 %v1135_v4  ;;  %1491 = vmatmul.mubr.f32.gmra.mrb[26].mxu1 %v2074_v17 }
 0x3de   : > { %v2078_v21 = vpop.eup %2077  ;;  %1206 = vadd.xlane.f32.xlu0 %v1205_v57  ;;  %2089 = vpow2.f32 %v937_v60  ;;  %v3042_v57 = vpop.permute.xlu0 %1268 }
 0x3df   : > { %v2080_v44 = vpop.eup %2079  ;;  %2091 = vpow2.f32 %v941_v8  ;;  %v1140_v8 = vld [vmem:[#allocation4 + $0x18] sm:$0xff] }
 0x3e0   : > { %1495 = vmatprep.mubr.f32.mxu1 %v2080_v44  ;;  %v1208_v34 = vadd.f32 %v2080_v44, %v2078_v21  ;;  %v3236_v44 = vld [vmem:[#allocation28_spill] sm:$0xff] }
 0x3e1   : > { %1496 = vmatmul.mubr.f32.gmra.mrb[28].mxu1 %v2078_v21  ;;  %v1137_v21 = vld [vmem:[#allocation4] sm:$0xff] }
 0x3e2   : > { %v2082_v35 = vpop.eup %2081 }
 0x3e3   : > { %v2084_v45 = vpop.eup %2083 }
 0x3e4   : > { %1500 = vmatprep.mubr.f32.mxu1 %v2084_v45  ;;  %v1211_v55 = vadd.f32 %v2084_v45, %v2082_v35  ;;  %v1138_v45 = vld [vmem:[#allocation4 + $0x8] sm:$0xff] }
 0x3e5   : > { %1501 = vmatmul.mubr.f32.gmra.mrb[30].mxu1 %v2082_v35 }
 0x3e6   : > { %v2086_v59 = vpop.eup %2085  ;;  %1212 = vadd.xlane.f32.xlu0 %v1211_v55 }
 0x3e7   : > { %v2088_v19 = vpop.eup %2087  ;;  %1185 = vadd.xlane.f32.xlu1 %v2943_v53  ;;  %v3213_v53 = vsub.f32 %v2830_v33, %v2838_v41  ;;  %v953_v33 = vmul.f32 1.442695, %v3216_v18 }
 0x3e8   : > { %1505 = vmatprep.mubr.f32.mxu1 %v2088_v19  ;;  %v1214_v20 = vadd.f32 %v2088_v19, %v2086_v59  ;;  %v2976_v51 = vpop.eup %2089 }
 0x3e9   : > { %1506 = vmatmul.mubr.f32.gmra.mrb[32].mxu1 %v2086_v59  ;;  %v945_v48 = vmul.f32 1.442695, %v3213_v53  ;;  %v2985_v41 = vpop.eup %2091  ;;  %v1154_v59 = vmul.f32 %v2945_v13, %v1138_v45  ;;  %v1157_v13 = vmul.f32 %v2976_v51, %v1141_v58 }
 0x3ea   : > { %v1159_v49 = vmul.f32 %v2985_v41, %v1143_v43  ;;  %v1152_v43 = vld [vmem:[#allocation4 + $0x78] sm:$0xff] }
 0x3eb   : > { %1191 = vadd.xlane.f32.xlu1 %v2952_v40  ;;  %2093 = vpow2.f32 %v945_v48  ;;  %v3214_v40 = vsub.f32 %v2850_v15, %v2858_v36  ;;  %v3217_v36 = vsub.f32 %v2780_v47, %v2788_v50  ;;  %v3222_v47 = vld [vmem:[#allocation25_spill] sm:$0xff] }
 0x3ec   : > { %v3223_v50 = vsub.f32 %v3221_v12, %v3222_v47 }
 0x3ed   : > { %v949_v6 = vmul.f32 1.442695, %v3214_v40  ;;  %v935_v15 = vmul.f32 1.442695, %v3217_v36 }
 0x3ee   : > { %v957_v62 = vmul.f32 1.442695, %v3223_v50 }
 0x3ef   : > { %1197 = vadd.xlane.f32.xlu1 %v1196_v11  ;;  %2095 = vpow2.f32 %v949_v6  ;;  %v3227_v11 = vld [vmem:[#allocation26_spill] sm:$0xff] }
 0x3f0   : > { %2097 = vpow2.f32 %v933_v9  ;;  %v3229_v25 = vsub.f32 %v3227_v11, %v3228_v61 }
 0x3f1   : > { %2099 = vpow2.f32 %v953_v33 }
 0x3f2   : > { %2101 = vpow2.f32 %v935_v15  ;;  %v959_v26 = vmul.f32 1.442695, %v3229_v25 }
 0x3f3   : > { %1203 = vadd.xlane.f32.xlu1 %v1202_v31  ;;  %2103 = vpow2.f32 %v955_v46 }
 0x3f4   : > { %2105 = vpow2.f32 %v939_v23 }
 0x3f5   : > { %v2994_v22 = vpop.eup %2093  ;;  %2107 = vpow2.f32 %v957_v62 }
 0x3f6   : > { %2109 = vpow2.f32 %v943_v10 }
 0x3f7   : > { %1209 = vadd.xlane.f32.xlu1 %v1208_v34  ;;  %2111 = vpow2.f32 %v959_v26  ;;  %v1153_v34 = vmul.f32 %v3236_v44, %v1137_v21  ;;  %v1144_v44 = vld [vmem:[#allocation4 + $0x38] sm:$0xff] }
 0x3f8   : > { %2113 = vpow2.f32 %v947_v14  ;;  %v1151_v14 = vld [vmem:[#allocation4 + $0x70] sm:$0xff] }
 0x3f9   : > { %v3003_v63 = vpop.eup %2095  ;;  %2115 = vpow2.f32 %v951_v56 }
 0x3fa   : > { %v2098_v24 = vpop.eup %2097 }
 0x3fb   : > { %1215 = vadd.xlane.f32.xlu1 %v1214_v20  ;;  %v3012_v39 = vpop.eup %2099  ;;  %v1139_v20 = vld [vmem:[#allocation4 + $0x10] sm:$0xff] }
 0x3fc   : > { %1288 = vperm.xlu0 %2018, %v2976_v51   ;;  %v2102_v28 = vpop.eup %2101  ;;  %v1155_v60 = vmul.f32 %v2098_v24, %v1139_v20  ;;  %v1145_v51 = vld [vmem:[#allocation4 + $0x40] sm:$0xff] }
 0x3fd   : > { %v3018_v29 = vpop.eup %2103  ;;  %v1156_v40 = vmul.f32 %v2102_v28, %v1140_v8  ;;  %v1161_v27 = vmul.f32 %v2994_v22, %v1145_v51 }
 0x3fe   : > { %v3024_v16 = vpop.eup %2105 }
 0x3ff   : > { %v3026_v31 = vpop.eup %2107 }
 0x400   : > { %1298 = vperm.xlu0 %2018, %v2985_v41   ;;  %v3030_v17 = vpop.eup %2109  ;;  %v1147_v41 = vld [vmem:[#allocation4 + $0x50] sm:$0xff]  ;;  %v1167_v3 = vmul.f32 %v3026_v31, %v1151_v14 }
 0x401   : > { %v3032_v32 = vpop.eup %2111  ;;  %v1163_v61 = vmul.f32 %v3003_v63, %v1147_v41  ;;  %v1254_v41 = vld [vmem:[#allocation5 + $0x20] sm:$0xff] }
 0x402   : > { %v3036_v4 = vpop.eup %2113 }
 0x403   : > { %v3039_v5 = vpop.eup %2115 }
 0x404   : > { %1308 = vperm.xlu0 %2018, %v2994_v22  }
 0x408   : > { %1318 = vperm.xlu0 %2018, %v3003_v63   ;;  %v1158_v63 = vmul.f32 %v3024_v16, %v1142_v54 }
 0x40c   : > { %1278 = vperm.xlu1 %2019, %v2098_v24   ;;  %1328 = vperm.xlu0 %2018, %v3012_v39   ;;  %v1149_v24 = vld [vmem:[#allocation4 + $0x60] sm:$0xff] }
 0x40d   : > { %v1165_v52 = vmul.f32 %v3012_v39, %v1149_v24  ;;  %v1160_v39 = vmul.f32 %v3030_v17, %v1144_v44 }
 0x410   : > { %1283 = vperm.xlu1 %2019, %v2102_v28   ;;  %1333 = vperm.xlu0 %2018, %v3018_v29  }
 0x414   : > { %1293 = vperm.xlu1 %2019, %v3024_v16   ;;  %1338 = vperm.xlu0 %2018, %v3026_v31   ;;  %v1250_v31 = vld [vmem:[#allocation5] sm:$0xff] }
 0x418   : > { %1303 = vperm.xlu1 %2019, %v3030_v17   ;;  %1343 = vperm.xlu0 %2018, %v3032_v32  }
 0x41c   : > { %1313 = vperm.xlu1 %2019, %v3036_v4  }
 0x420   : > { %1323 = vperm.xlu1 %2019, %v3039_v5  }
 0x43b   : > { %v1171_v35 = vpop.xlane.xlu0 %1170 }
 0x43c   : > { %v1217_v55 = vadd.f32 %v1171_v35, %v1153_v34 }
 0x43e   : > { %1234 = vst.msk [vmem:[#allocation4] sm:$0xff] %vm463_vm3, %v1217_v55 }
 0x43f   : > { %v1174_v19 = vpop.xlane.xlu1 %1173 }
 0x440   : > { %v1218_v42 = vadd.f32 %v1174_v19, %v1154_v59  ;;  %v1146_v59 = vld [vmem:[#allocation4 + $0x48] sm:$0xff] }
 0x441   : > { %v1162_v16 = vmul.f32 %v3036_v4, %v1146_v59 }
 0x442   : > { %1235 = vst.msk [vmem:[#allocation4 + $0x8] sm:$0xff] %vm463_vm3, %v1218_v42  ;;  %v1148_v42 = vld [vmem:[#allocation4 + $0x58] sm:$0xff] }
 0x443   : > { %v1177_v7 = vpop.xlane.xlu0 %1176  ;;  %v1274_v28 = vpop.permute.xlu1 %1273  ;;  %v1164_v17 = vmul.f32 %v3039_v5, %v1148_v42 }
 0x444   : > { %v1219_v53 = vadd.f32 %v1177_v7, %v1155_v60 }
 0x445   : > { %v1562_v48 = vld [vmem:[#allocation4] sm:$0xff] }
 0x446   : > { %1236 = vst.msk [vmem:[#allocation4 + $0x10] sm:$0xff] %vm463_vm3, %v1219_v53  ;;  %2117 = vrcp.f32 %v1562_v48  ;;  %v1346_v53 = vmul.f32 %v3042_v57, %v1250_v31 }
 0x447   : > { %v1180_v6 = vpop.xlane.xlu0 %1179 }
 0x448   : > { %v1220_v9 = vadd.f32 %v1180_v6, %v1156_v40  ;;  %v1251_v40 = vld [vmem:[#allocation5 + $0x8] sm:$0xff] }
 0x449   : > { %v1563_v18 = vld [vmem:[#allocation4 + $0x8] sm:$0xff] }
 0x44a   : > { %1237 = vst.msk [vmem:[#allocation4 + $0x18] sm:$0xff] %vm463_vm3, %v1220_v9  ;;  %2119 = vrcp.f32 %v1563_v18  ;;  %v1150_v9 = vld [vmem:[#allocation4 + $0x68] sm:$0xff] }
 0x44b   : > { %v1183_v33 = vpop.xlane.xlu0 %1182  ;;  %v1166_v57 = vmul.f32 %v3018_v29, %v1150_v9 }
 0x44c   : > { %v1221_v36 = vadd.f32 %v1183_v33, %v1157_v13 }
 0x44d   : > { %v1564_v15 = vld [vmem:[#allocation4 + $0x10] sm:$0xff] }
 0x44e   : > { %1238 = vst.msk [vmem:[#allocation4 + $0x20] sm:$0xff] %vm463_vm3, %v1221_v36  ;;  %2121 = vrcp.f32 %v1564_v15  ;;  %v1347_v36 = vmul.f32 %v1274_v28, %v1251_v40 }
 0x450   : > { %v2118_v46 = vpop.eup %2117 }
 0x451   : > { %1612 = vperm.xlu0 %2018, %v2118_v46   ;;  %v1565_v0 = vld [vmem:[#allocation4 + $0x18] sm:$0xff] }
 0x452   : > { %2123 = vrcp.f32 %v1565_v0 }
 0x453   : > { %v1189_v23 = vpop.xlane.xlu0 %1188 }
 0x454   : > { %v2120_v12 = vpop.eup %2119  ;;  %v1223_v47 = vadd.f32 %v1189_v23, %v1159_v49 }
 0x455   : > { %1617 = vperm.xlu1 %2019, %v2120_v12   ;;  %v1566_v50 = vld [vmem:[#allocation4 + $0x20] sm:$0xff]  ;;  %v1168_v12 = vmul.f32 %v3032_v32, %v1152_v43 }
 0x456   : > { %1240 = vst.msk [vmem:[#allocation4 + $0x30] sm:$0xff] %vm463_vm3, %v1223_v47  ;;  %2125 = vrcp.f32 %v1566_v50 }
 0x458   : > { %v2122_v62 = vpop.eup %2121 }
 0x459   : > { %1622 = vperm.xlu0 %2018, %v2122_v62  }
 0x45b   : > { %v1195_v38 = vpop.xlane.xlu0 %1194 }
 0x45c   : > { %v2124_v37 = vpop.eup %2123  ;;  %v1225_v10 = vadd.f32 %v1195_v38, %v1161_v27 }
 0x45d   : > { %1627 = vperm.xlu1 %2019, %v2124_v37   ;;  %v1568_v4 = vld [vmem:[#allocation4 + $0x30] sm:$0xff] }
 0x45e   : > { %1242 = vst.msk [vmem:[#allocation4 + $0x40] sm:$0xff] %vm463_vm3, %v1225_v10  ;;  %v1252_v37 = vld [vmem:[#allocation5 + $0x10] sm:$0xff] }
 0x460   : > { %v2126_v11 = vpop.eup %2125 }
 0x461   : > { %1632 = vperm.xlu0 %2018, %v2126_v11  }
 0x463   : > { %v1201_v25 = vpop.xlane.xlu0 %1200 }
 0x464   : > { %v1227_v26 = vadd.f32 %v1201_v25, %v1163_v61 }
 0x465   : > { %v1570_v62 = vld [vmem:[#allocation4 + $0x40] sm:$0xff] }
 0x466   : > { %1244 = vst.msk [vmem:[#allocation4 + $0x50] sm:$0xff] %vm463_vm3, %v1227_v26 }
 0x46b   : > { %v1207_v1 = vpop.xlane.xlu0 %1206 }
 0x46c   : > { %v1229_v22 = vadd.f32 %v1207_v1, %v1165_v52  ;;  %v1253_v52 = vld [vmem:[#allocation5 + $0x18] sm:$0xff] }
 0x46d   : > { %v1572_v2 = vld [vmem:[#allocation4 + $0x50] sm:$0xff] }
 0x46e   : > { %1246 = vst.msk [vmem:[#allocation4 + $0x60] sm:$0xff] %vm463_vm3, %v1229_v22  ;;  %2127 = vrcp.f32 %v1572_v2 }
 0x473   : > { %v1213_v30 = vpop.xlane.xlu0 %1212 }
 0x474   : > { %v1231_v56 = vadd.f32 %v1213_v30, %v1167_v3  ;;  %v1186_v21 = vpop.xlane.xlu1 %1185 }
 0x475   : > { %v1222_v34 = vadd.f32 %v1186_v21, %v1158_v63  ;;  %v1574_v35 = vld [vmem:[#allocation4 + $0x60] sm:$0xff] }
 0x476   : > { %1248 = vst.msk [vmem:[#allocation4 + $0x70] sm:$0xff] %vm463_vm3, %v1231_v56  ;;  %2129 = vrcp.f32 %v1574_v35  ;;  %v1255_v56 = vld [vmem:[#allocation5 + $0x28] sm:$0xff] }
 0x477   : > { %1239 = vst.msk [vmem:[#allocation4 + $0x28] sm:$0xff] %vm463_vm3, %v1222_v34  ;;  %v1256_v34 = vld [vmem:[#allocation5 + $0x30] sm:$0xff] }
 0x478   : > { %v2128_v45 = vpop.eup %2127  ;;  %v1192_v55 = vpop.xlane.xlu1 %1191 }
 0x479   : > { %v1224_v19 = vadd.f32 %v1192_v55, %v1160_v39  ;;  %1662 = vperm.xlu0 %2018, %v2128_v45  }
 0x47b   : > { %1241 = vst.msk [vmem:[#allocation4 + $0x38] sm:$0xff] %vm463_vm3, %v1224_v19  ;;  %v1289_v10 = vpop.permute.xlu0 %1288 }
 0x47c   : > { %v1198_v20 = vpop.xlane.xlu1 %1197  ;;  %v1350_v1 = vmul.f32 %v1289_v10, %v1254_v41 }
 0x47d   : > { %v1226_v60 = vadd.f32 %v1198_v20, %v1162_v16  ;;  %v1576_v7 = vld [vmem:[#allocation4 + $0x70] sm:$0xff]  ;;  %v1257_v20 = vld [vmem:[#allocation5 + $0x38] sm:$0xff] }
 0x47e   : > { %2131 = vrcp.f32 %v1576_v7  ;;  %v1567_v8 = vld [vmem:[#allocation4 + $0x28] sm:$0xff] }
 0x47f   : > { %1243 = vst.msk [vmem:[#allocation4 + $0x48] sm:$0xff] %vm463_vm3, %v1226_v60  ;;  %2133 = vrcp.f32 %v1567_v8  ;;  %v1299_v21 = vpop.permute.xlu0 %1298 }
 0x480   : > { %v2130_v48 = vpop.eup %2129  ;;  %v1204_v6 = vpop.xlane.xlu1 %1203  ;;  %2135 = vrcp.f32 %v1568_v4  ;;  %v1352_v16 = vmul.f32 %v1299_v21, %v1256_v34  ;;  %v1265_v21 = vld [vmem:[#allocation5 + $0x78] sm:$0xff] }
 0x481   : > { %v1432_v58 = vpop.f32.mrb[2].mxu1  ;;  %v1228_v18 = vadd.f32 %v1204_v6, %v1164_v17  ;;  %1672 = vperm.xlu0 %2018, %v2130_v48   ;;  %v1258_v6 = vld [vmem:[#allocation5 + $0x40] sm:$0xff] }
 0x482   : > { %v1511_v13 = vadd.f32 %v1432_v58, %v1346_v53  ;;  %v1434_v33 = vpop.f32.mrb[3].mxu1  ;;  %v1569_v46 = vld [vmem:[#allocation4 + $0x38] sm:$0xff] }
 0x483   : > { %1245 = vst.msk [vmem:[#allocation4 + $0x58] sm:$0xff] %vm463_vm3, %v1228_v18  ;;  %2137 = vrcp.f32 %v1569_v46  ;;  %v1309_v53 = vpop.permute.xlu0 %1308 }
 0x484   : > { %1527 = vst.msk [vmem:[#allocation5] sm:$0xff] %vm337_vm1, %v1511_v13  ;;  %v1210_v5 = vpop.xlane.xlu1 %1209  ;;  %v1437_v15 = vpop.f32.mrb[4].mxu1  ;;  %2139 = vrcp.f32 %v1570_v62  ;;  %v1354_v13 = vmul.f32 %v1309_v53, %v1258_v6 }
 0x485   : > { %v1230_v0 = vadd.f32 %v1210_v5, %v1166_v57  ;;  %v1512_v49 = vadd.f32 %v1437_v15, %v1347_v36  ;;  %v1439_v23 = vpop.f32.mrb[5].mxu1  ;;  %v1259_v36 = vld [vmem:[#allocation5 + $0x48] sm:$0xff] }
 0x486   : > { %v1571_v25 = vld [vmem:[#allocation4 + $0x48] sm:$0xff] }
 0x487   : > { %1247 = vst.msk [vmem:[#allocation4 + $0x68] sm:$0xff] %vm463_vm3, %v1230_v0  ;;  %2141 = vrcp.f32 %v1571_v25  ;;  %v1319_v33 = vpop.permute.xlu0 %1318 }
 0x488   : > { %1528 = vst.msk [vmem:[#allocation5 + $0x8] sm:$0xff] %vm337_vm1, %v1512_v49  ;;  %v2132_v47 = vpop.eup %2131  ;;  %v1216_v50 = vpop.xlane.xlu1 %1215  ;;  %v1260_v49 = vld [vmem:[#allocation5 + $0x50] sm:$0xff] }
 0x489   : > { %v1442_v51 = vpop.f32.mrb[6].mxu1  ;;  %v2134_v29 = vpop.eup %2133  ;;  %v1232_v27 = vadd.f32 %v1216_v50, %v1168_v12  ;;  %1682 = vperm.xlu0 %2018, %v2132_v47   ;;  %v1356_v62 = vmul.f32 %v1319_v33, %v1260_v49 }
 0x48a   : > { %v1444_v38 = vpop.f32.mrb[7].mxu1  ;;  %1637 = vperm.xlu1 %2019, %v2134_v29   ;;  %v2136_v32 = vpop.eup %2135  ;;  %v1573_v28 = vld [vmem:[#allocation4 + $0x58] sm:$0xff] }
 0x48b   : > { %1249 = vst.msk [vmem:[#allocation4 + $0x78] sm:$0xff] %vm463_vm3, %v1232_v27  ;;  %2143 = vrcp.f32 %v1573_v28  ;;  %v1261_v29 = vld [vmem:[#allocation5 + $0x58] sm:$0xff] }
 0x48c   : > { %v1279_v11 = vpop.permute.xlu1 %1278  ;;  %v1447_v61 = vpop.f32.mrb[8].mxu1 }
 0x48d   : > { %v1348_v26 = vmul.f32 %v1279_v11, %v1252_v37  ;;  %v1449_v24 = vpop.f32.mrb[9].mxu1  ;;  %v2138_v54 = vpop.eup %2137  ;;  %v1262_v11 = vld [vmem:[#allocation5 + $0x60] sm:$0xff] }
 0x48e   : > { %1642 = vperm.xlu1 %2019, %v2136_v32   ;;  %v1575_v45 = vld [vmem:[#allocation4 + $0x68] sm:$0xff]  ;;  %v2140_v55 = vpop.eup %2139 }
 0x48f   : > { %v1513_v22 = vadd.f32 %v1442_v51, %v1348_v26  ;;  %2145 = vrcp.f32 %v1575_v45  ;;  %v1329_v51 = vpop.permute.xlu0 %1328 }
 0x490   : > { %v1284_v2 = vpop.permute.xlu1 %1283  ;;  %v1452_v14 = vpop.f32.mrb[10].mxu1  ;;  %v1358_v24 = vmul.f32 %v1329_v51, %v1262_v11 }
 0x491   : > { %1529 = vst.msk [vmem:[#allocation5 + $0x10] sm:$0xff] %vm337_vm1, %v1513_v22  ;;  %v1349_v3 = vmul.f32 %v1284_v2, %v1253_v52  ;;  %v1515_v30 = vadd.f32 %v1452_v14, %v1350_v1  ;;  %v1454_v63 = vpop.f32.mrb[11].mxu1  ;;  %v2142_v8 = vpop.eup %2141  ;;  %v1263_v52 = vld [vmem:[#allocation5 + $0x68] sm:$0xff] }
 0x492   : > { %1647 = vperm.xlu1 %2019, %v2138_v54   ;;  %v1577_v7 = vld [vmem:[#allocation4 + $0x78] sm:$0xff]  ;;  %v1264_v54 = vld [vmem:[#allocation5 + $0x70] sm:$0xff] }
 0x493   : > { %v1514_v44 = vadd.f32 %v1447_v61, %v1349_v3  ;;  %1531 = vst.msk [vmem:[#allocation5 + $0x20] sm:$0xff] %vm337_vm1, %v1515_v30  ;;  %2147 = vrcp.f32 %v1577_v7  ;;  %v1334_v61 = vpop.permute.xlu0 %1333 }
 0x494   : > { %v1294_v35 = vpop.permute.xlu1 %1293  ;;  %v1457_v39 = vpop.f32.mrb[12].mxu1  ;;  %v1359_v28 = vmul.f32 %v1334_v61, %v1263_v52 }
 0x495   : > { %1530 = vst.msk [vmem:[#allocation5 + $0x18] sm:$0xff] %vm337_vm1, %v1514_v44  ;;  %v1351_v59 = vmul.f32 %v1294_v35, %v1255_v56  ;;  %v1459_v19 = vpop.f32.mrb[13].mxu1  ;;  %v2144_v9 = vpop.eup %2143 }
 0x496   : > { %1652 = vperm.xlu1 %2019, %v2140_v55  }
 0x497   : > { %v1516_v31 = vadd.f32 %v1457_v39, %v1351_v59  ;;  %v1339_v14 = vpop.permute.xlu0 %1338 }
 0x498   : > { %v1304_v42 = vpop.permute.xlu1 %1303  ;;  %v1462_v60 = vpop.f32.mrb[14].mxu1  ;;  %v1360_v56 = vmul.f32 %v1339_v14, %v1264_v54  ;;  %v1738_v14 = vld [vmem:[%s2541_s30] sm:$0xf]  ;;  %s2183_s30 = sshll.u32 %s2308_s27, 4  ;;  %s2184_s30 = int_to_ptr.vmem [resolvable:$false] %s2183_s30 }
 0x499   : > { %1532 = vst.msk [vmem:[#allocation5 + $0x28] sm:$0xff] %vm337_vm1, %v1516_v31  ;;  %v1517_v17 = vadd.f32 %v1462_v60, %v1352_v16  ;;  %v1464_v48 = vpop.f32.mrb[15].mxu1  ;;  %v1353_v40 = vmul.f32 %v1304_v42, %v1257_v20  ;;  %v2146_v15 = vpop.eup %2145  ;;  %v1594_v16 = vld [vmem:[#allocation5] sm:$0xff]  ;;  %v1595_v60 = vld [vmem:[#allocation5 + $0x8] sm:$0xff]  ;;  %s2185_s15 = scalar_lea.vmem %s2184_s30, 128  ;;  %p2186_p8 = scmp.lt.s32.totalorder %s3100_s18, %s2184_s30 }
 0x49a   : > { %1657 = vperm.xlu1 %2019, %v2142_v8   ;;  %v1596_v8 = vld [vmem:[#allocation5 + $0x10] sm:$0xff]  ;;  %p2187_p10 = scmp.lt.s32.totalorder %s2185_s15, %s2179_s28 }
 0x49b   : > { %1533 = vst.msk [vmem:[#allocation5 + $0x30] sm:$0xff] %vm337_vm1, %v1517_v17  ;;  %v1344_v44 = vpop.permute.xlu0 %1343 }
 0x49c   : > { %v1467_v58 = vpop.f32.mrb[16].mxu1  ;;  %v1314_v57 = vpop.permute.xlu1 %1313  ;;  %v1361_v45 = vmul.f32 %v1344_v44, %v1265_v21  ;;  %v1597_v48 = vld [vmem:[#allocation5 + $0x18] sm:$0xff]  ;;  %p2188_p3 = por %p2187_p10, %p2186_p8 }
 0x49d   : > { %v1518_v4 = vadd.f32 %v1467_v58, %v1353_v40  ;;  %v1469_v18 = vpop.f32.mrb[17].mxu1  ;;  %v1355_v0 = vmul.f32 %v1314_v57, %v1259_v36  ;;  %v2148_v12 = vpop.eup %2147  ;;  %v1598_v58 = vld [vmem:[#allocation5 + $0x20] sm:$0xff] }
 0x49e   : > { %1667 = vperm.xlu1 %2019, %v2144_v9   ;;  %p2189_p13 = pnand %p2188_p3, %p2182_p1 }
 0x49f   : > { %1534 = vst.msk [vmem:[#allocation5 + $0x38] sm:$0xff] %vm337_vm1, %v1518_v4 }
 0x4a0   : > { %v1472_v5 = vpop.f32.mrb[18].mxu1  ;;  %v1324_v27 = vpop.permute.xlu1 %1323  ;;  %v1599_v18 = vld [vmem:[#allocation5 + $0x28] sm:$0xff] }
 0x4a1   : > { %v1519_v43 = vadd.f32 %v1472_v5, %v1354_v13  ;;  %v1474_v46 = vpop.f32.mrb[19].mxu1  ;;  %v1357_v41 = vmul.f32 %v1324_v27, %v1261_v29 }
 0x4a2   : > { %1677 = vperm.xlu1 %2019, %v2146_v15   ;;  %v1600_v57 = vld [vmem:[#allocation5 + $0x30] sm:$0xff] }
 0x4a3   : > { %1535 = vst.msk [vmem:[#allocation5 + $0x40] sm:$0xff] %vm337_vm1, %v1519_v43 }
 0x4a4   : > { %v1477_v23 = vpop.f32.mrb[20].mxu1 }
 0x4a5   : > { %v1520_v47 = vadd.f32 %v1477_v23, %v1355_v0  ;;  %v1479_v50 = vpop.f32.mrb[21].mxu1 }
 0x4a6   : > { %1687 = vperm.xlu1 %2019, %v2148_v12   ;;  %v1601_v15 = vld [vmem:[#allocation5 + $0x38] sm:$0xff] }
 0x4a7   : > { %1536 = vst.msk [vmem:[#allocation5 + $0x48] sm:$0xff] %vm337_vm1, %v1520_v47 }
 0x4a8   : > { %v1482_v38 = vpop.f32.mrb[22].mxu1 }
 0x4a9   : > { %v1521_v37 = vadd.f32 %v1482_v38, %v1356_v62  ;;  %v1484_v10 = vpop.f32.mrb[23].mxu1 }
 0x4aa   : > { %v1602_v49 = vld [vmem:[#allocation5 + $0x40] sm:$0xff] }
 0x4ab   : > { %1537 = vst.msk [vmem:[#allocation5 + $0x50] sm:$0xff] %vm337_vm1, %v1521_v37 }
 0x4ac   : > { %v1487_v25 = vpop.f32.mrb[24].mxu1 }
 0x4ad   : > { %v1522_v32 = vadd.f32 %v1487_v25, %v1357_v41  ;;  %v1489_v26 = vpop.f32.mrb[25].mxu1 }
 0x4ae   : > { %v1603_v12 = vld [vmem:[#allocation5 + $0x48] sm:$0xff] }
 0x4af   : > { %1538 = vst.msk [vmem:[#allocation5 + $0x58] sm:$0xff] %vm337_vm1, %v1522_v32 }
 0x4b0   : > { %v1492_v1 = vpop.f32.mrb[26].mxu1 }
 0x4b1   : > { %v1523_v22 = vadd.f32 %v1492_v1, %v1358_v24  ;;  %v1494_v2 = vpop.f32.mrb[27].mxu1 }
 0x4b2   : > { %v1604_v62 = vld [vmem:[#allocation5 + $0x50] sm:$0xff] }
 0x4b3   : > { %1539 = vst.msk [vmem:[#allocation5 + $0x60] sm:$0xff] %vm337_vm1, %v1523_v22 }
 0x4b4   : > { %v1497_v3 = vpop.f32.mrb[28].mxu1 }
 0x4b5   : > { %v1524_v30 = vadd.f32 %v1497_v3, %v1359_v28  ;;  %v1499_v63 = vpop.f32.mrb[29].mxu1 }
 0x4b6   : > { %v1605_v38 = vld [vmem:[#allocation5 + $0x58] sm:$0xff] }
 0x4b7   : > { %1540 = vst.msk [vmem:[#allocation5 + $0x68] sm:$0xff] %vm337_vm1, %v1524_v30 }
 0x4b8   : > { %v1502_v34 = vpop.f32.mrb[30].mxu1 }
 0x4b9   : > { %v1525_v35 = vadd.f32 %v1502_v34, %v1360_v56  ;;  %v1504_v39 = vpop.f32.mrb[31].mxu1 }
 0x4ba   : > { %v1606_v41 = vld [vmem:[#allocation5 + $0x60] sm:$0xff] }
 0x4bb   : > { %1541 = vst.msk [vmem:[#allocation5 + $0x70] sm:$0xff] %vm337_vm1, %v1525_v35 }
 0x4bc   : > { %v1507_v55 = vpop.f32.mrb[32].mxu1 }
 0x4bd   : > { %v1526_v59 = vadd.f32 %v1507_v55, %v1361_v45  ;;  %v1509_v19 = vpop.f32.mrb[33].mxu1 }
 0x4be   : > { %v1607_v25 = vld [vmem:[#allocation5 + $0x68] sm:$0xff] }
 0x4bf   : > { %1542 = vst.msk [vmem:[#allocation5 + $0x78] sm:$0xff] %vm337_vm1, %v1526_v59 }
 0x4c2   : > { %v1608_v24 = vld [vmem:[#allocation5 + $0x70] sm:$0xff] }
 0x4c6   : > { %v1609_v22 = vld [vmem:[#allocation5 + $0x78] sm:$0xff] }
 0x4d0   : > { %v1613_v31 = vpop.permute.xlu0 %1612 }
 0x4d1   : > { %v1690_v20 = vmul.f32 %v1613_v31, %v1594_v16 }
 0x4d3   : > { %1706 = vxpose.xlu0.b32.start [1/16] (narrow) %v1690_v20, 8 }
 0x4d4   : > { %v1618_v42 = vpop.permute.xlu1 %1617 }
 0x4d5   : > { %v1691_v7 = vmul.f32 %v1618_v42, %v1595_v60 }
 0x4d7   : > { %1707 = vxpose.xlu0.b32.cont [2/16] (narrow) %v1691_v7, 8 }
 0x4d8   : > { %v1623_v53 = vpop.permute.xlu0 %1622 }
 0x4d9   : > { %v1692_v17 = vmul.f32 %v1623_v53, %v1596_v8 }
 0x4db   : > { %1708 = vxpose.xlu0.b32.cont [3/16] (narrow) %v1692_v17, 8 }
 0x4dc   : > { %v1628_v40 = vpop.permute.xlu1 %1627 }
 0x4dd   : > { %v1693_v6 = vmul.f32 %v1628_v40, %v1597_v48 }
 0x4df   : > { %1709 = vxpose.xlu0.b32.cont [4/16] (narrow) %v1693_v6, 8 }
 0x4e0   : > { %v1633_v9 = vpop.permute.xlu0 %1632 }
 0x4e1   : > { %v1694_v4 = vmul.f32 %v1633_v9, %v1598_v58 }
 0x4e3   : > { %1710 = vxpose.xlu0.b32.cont [5/16] (narrow) %v1694_v4, 8 }
 0x4f8   : > { %v1663_v51 = vpop.permute.xlu0 %1662 }
 0x4f9   : > { %v1700_v29 = vmul.f32 %v1663_v51, %v1604_v62 }
 0x500   : > { %v1673_v10 = vpop.permute.xlu0 %1672 }
 0x501   : > { %v1702_v11 = vmul.f32 %v1673_v10, %v1606_v41 }
 0x508   : > { %v1683_v26 = vpop.permute.xlu0 %1682 }
 0x509   : > { %v1638_v13 = vpop.permute.xlu1 %1637  ;;  %v1704_v52 = vmul.f32 %v1683_v26, %v1608_v24 }
 0x50a   : > { %v1695_v33 = vmul.f32 %v1638_v13, %v1599_v18 }
 0x50c   : > { %1711 = vxpose.xlu0.b32.cont [6/16] (narrow) %v1695_v33, 8 }
 0x50d   : > { %v1643_v36 = vpop.permute.xlu1 %1642 }
 0x50e   : > { %v1696_v5 = vmul.f32 %v1643_v36, %v1600_v57 }
 0x510   : > { %1712 = vxpose.xlu0.b32.cont [7/16] (narrow) %v1696_v5, 8 }
 0x511   : > { %v1648_v43 = vpop.permute.xlu1 %1647 }
 0x512   : > { %v1697_v46 = vmul.f32 %v1648_v43, %v1601_v15 }
 0x514   : > { %1713 = vxpose.xlu0.b32.cont [8/16] (narrow) %v1697_v46, 8 }
 0x515   : > { %v1653_v0 = vpop.permute.xlu1 %1652 }
 0x516   : > { %v1698_v23 = vmul.f32 %v1653_v0, %v1602_v49 }
 0x518   : > { %1714 = vxpose.xlu0.b32.cont [9/16] (narrow) %v1698_v23, 8 }
 0x519   : > { %v1658_v47 = vpop.permute.xlu1 %1657 }
 0x51a   : > { %v1699_v50 = vmul.f32 %v1658_v47, %v1603_v12 }
 0x51c   : > { %1715 = vxpose.xlu0.b32.cont [10/16] (narrow) %v1699_v50, 8 }
 0x51d   : > { %v1668_v27 = vpop.permute.xlu1 %1667 }
 0x51e   : > { %v1701_v37 = vmul.f32 %v1668_v27, %v1605_v38 }
 0x520   : > { %1716 = vxpose.xlu0.b32.cont [11/16] (narrow) %v1700_v29, 8 }
 0x521   : > { %v1678_v61 = vpop.permute.xlu1 %1677 }
 0x522   : > { %v1703_v32 = vmul.f32 %v1678_v61, %v1607_v25 }
 0x524   : > { %1717 = vxpose.xlu0.b32.cont [12/16] (narrow) %v1701_v37, 8 }
 0x525   : > { %v1688_v1 = vpop.permute.xlu1 %1687 }
 0x526   : > { %v1705_v2 = vmul.f32 %v1688_v1, %v1609_v22 }
 0x528   : > { %1718 = vxpose.xlu0.b32.cont [13/16] (narrow) %v1702_v11, 8 }
 0x52c   : > { %1719 = vxpose.xlu0.b32.cont [14/16] (narrow) %v1703_v32, 8 }
 0x530   : > { %1720 = vxpose.xlu0.b32.cont [15/16] (narrow) %v1704_v52, 8 }
 0x534   : > { %1721 = vxpose.xlu0.b32.end [16/16] (narrow) %v1705_v2, 8 }
 0x578   : > { %v1722_v28 = vpop.trf.xlu0 }
 0x579   : > { %v1739_v54 = vadd.f32 %v1738_v14, %v1722_v28 }
 0x57b   : > { %1740 = vst [vmem:[%s315_s14] sm:$0xf] %v1739_v54 }
 0x57c   : > { %2192 = shalt.err (!%p2189_p13)
}
 0x57d   : > { %s2193_s13 = scalar_lea.hbm %s3098_s29, 64  ;;  %s2197_s8 = scalar_lea.hbm %s3166_s6, 256 }
 0x57e   : > { %p2194_p0 = scmp.ne.s32.totalorder %s3098_s29, %s2193_s13  ;;  %p2198_p9 = scmp.lt.u32.totalorder %s3098_s29, %s3166_s6 }
 0x57f   : > { %p2199_p12 = scmp.lt.u32.totalorder %s2197_s8, %s2193_s13  ;;  %p2201_p7 = scmp.lt.u32.totalorder %s2193_s13, %s3098_s29 }
 0x580   : > { %p2195_p5 = pnand %p2194_p0, %p3237_p4 }
 0x581   : > { %p2200_p2 = por %p2199_p12, %p2198_p9 }
 0x582   : > { %p2196_p6 = pneg %p2195_p5 }
 0x583   : > { %p2202_p11 = por %p2201_p7, %p2200_p2 }
 0x585   : > { %p2203_p1 = pnand %p2202_p11, %p2196_p6 }
 0x587   : > { %2206 = shalt.err (!%p2203_p1)
}
 0x588   : > { %1914 = dma.vmem_to_hbm [thread:$0]  (%p3237_p4), %s3100_s18, 64, %s3098_s29, %s1742_s16  }
 0x589 PF: > { %p1925_p8 = scmp.ge.s32.totalorder %s2301_s7, 2  ;;  %s1769_s14 = sand.u32 1, %s2261_s21  }
 0x58a   : > { %p3238_p10 = scmp.ne.s32.totalorder %s3193_s11, 0  ;;  %s1770_s17 = scalar_lea.sflag [#allocation8], %s1769_s14 }
 0x58c   : > { %p1921_p3 = pnand %p1925_p8, %p3238_p10 }
 0x58e   : > { %2256 = dma.done.wait (!%p1921_p3), %s1770_s17, 64  }
 0x58f   : > { %2258 = vsyncadd (!%p1921_p3), %s1770_s17, 4294967232  ;;  %s22_s7 = sadd.s32 1, %s2301_s7   ;;  %s3239_s19 = sld [smem:[#allocation16_spill]] }
 0x590   : > { %p19_p13 = scmp.ge.s32.totalorder %s22_s7, 6   ;;  %s3240_s27 = sld [smem:[#allocation12_spill]] }
 0x591   : > { %s3241_s28 = sld [smem:[#allocation13_spill]]  ;;  %s3242_s29 = sld [smem:[#allocation14_spill]] }
 0x592   : > { %s3243_s30 = sld [smem:[#allocation15_spill]]  ;;  %s3244_s21 = smov %s2265_s22 }
 0x593   : > { %s3245_s22 = smov %s2269_s23  ;;  %s3246_s23 = smov %s2434_s24 }
 0x594   : > { %s3247_s24 = smov %s2277_s25  ;;  %s3248_s25 = smov %s2281_s26 }
 0x595   : > { %s3249_s26 = smov %s3239_s19  ;;  %21 = sbr.rel (!%p19_p13) target bundleno = 11 (0xb), region = 100 }
 0x59c   :  { %1775 = vsyncpa [#allocation7], 1 }
 0x59d   :  { %1777 = vsyncpa [#allocation7 + $0x1], 1 }
 0x59e   :  { %1778 = vsyncpa [#allocation8], 1 }
 0x59f   :  { %1780 = vsyncpa [#allocation8 + $0x1], 1 }

</bundles_post_ra>
